<compile_context>
chip_gen: v7x
topology: tpu7x:2x2x1
jax: 0.10.0
libtpu: 0.0.40
codegen_flags: <defaults>
</compile_context>

<pallas_src>
import numpy as np

import jax
import jax.numpy as jnp
from jax import lax
from jax.experimental import pallas as pl
from jax.experimental.pallas import tpu as pltpu

VMEM_SPEC = pl.BlockSpec(memory_space=pltpu.MemorySpace.VMEM)
BN_EPS = 1e-5


# --------------------------------------------------------------------------- #
# Parameter initialization (PyTorch-like shapes, deterministic)
# --------------------------------------------------------------------------- #
def _conv_params(key, c_in, c_out, k, groups=1):
    k1, k2 = jax.random.split(key)
    fan_in = (c_in // groups) * k
    bound = 1.0 / np.sqrt(fan_in)
    w = jax.random.uniform(k1, (c_out, c_in // groups, k), jnp.float32, -bound, bound)
    b = jax.random.uniform(k2, (c_out,), jnp.float32, -bound, bound)
    return w, b


def _residual_block_params(key, c_in, c_out, k, groups=1):
    k1, k2 = jax.random.split(key)
    w, b = _conv_params(k1, c_in, c_out, k, groups=groups)
    p = {"w": w, "b": b}
    if c_in != c_out:
        # ResNet-style skip projection (1x1 conv) for the 'sum' aggregator.
        pw, pb = _conv_params(k2, c_in, c_out, 1)
        p["proj_w"], p["proj_b"] = pw, pb
    return p


def init_skip_encoder(key, latent_dim, channels, kernel_size, timesteps):
    channels = list(channels)
    keys = jax.random.split(key, 8 + len(timesteps))
    ki = iter(keys)
    params = {}

    c0 = channels[0]
    c_half = (c0 + 1) // 2
    params["reduce_x"] = _residual_block_params(next(ki), c0, c_half, kernel_size)
    params["reduce_dx"] = _residual_block_params(next(ki), c0, c_half, kernel_size)
    channels[0] = c0 + c0 % 2

    layers = []
    for i in range(len(timesteps) - 1):
        layers.append({
            "conv": _residual_block_params(next(ki), channels[i], channels[i + 1],
                                           kernel_size, groups=2),
            "dilation": i + 1,
        })
    params["layers"] = layers

    feat = channels[-1] * timesteps[-1]
    kf1, kf2 = jax.random.split(next(ki))
    bound = 1.0 / np.sqrt(feat)
    params["fc"] = {
        "w_t": jax.random.uniform(kf1, (feat, latent_dim), jnp.float32, -bound, bound),
        "b": jax.random.uniform(kf2, (1, latent_dim), jnp.float32, -bound, bound),
        "gamma": jnp.ones((1, latent_dim), jnp.float32),
        "beta": jnp.zeros((1, latent_dim), jnp.float32),
    }
    return params


# --------------------------------------------------------------------------- #
# Host-side preprocessing: fold blocks into dense per-layer matrices
# --------------------------------------------------------------------------- #
def _fused_block_wcat(p, c_in, c_out, kernel_size, dilation, groups):
    """Per-tap (c_out, c_in) block-diagonal weights (grouped conv) with the skip path
    folded into the zero-offset tap, concatenated into one (c_out, K*c_in) matrix, plus
    the combined bias as a (c_out, 1) column and the list of time offsets per tap."""
    assert kernel_size % 2 == 1, "same-padding fold assumes an odd kernel size"
    assert c_in % groups == 0 and c_out % groups == 0
    w = np.asarray(p["w"], np.float32)            # (c_out, c_in//groups, K)
    bias = np.asarray(p["b"], np.float32).copy()  # (c_out,)
    c_in_g, c_out_g = c_in // groups, c_out // groups
    pad = dilation * (kernel_size - 1) // 2

    taps, offsets = [], []
    for k in range(kernel_size):
        wk = np.zeros((c_out, c_in), np.float32)
        for g in range(groups):
            wk[g * c_out_g:(g + 1) * c_out_g, g * c_in_g:(g + 1) * c_in_g] = \
                w[g * c_out_g:(g + 1) * c_out_g, :, k]
        taps.append(wk)
        offsets.append(k * dilation - pad)

    center = offsets.index(0)
    if "proj_w" in p:                              # 1x1 projection skip
        taps[center] = taps[center] + np.asarray(p["proj_w"], np.float32)[:, :, 0]
        bias = bias + np.asarray(p["proj_b"], np.float32)
    else:                                          # identity skip
        assert c_in == c_out
        taps[center] = taps[center] + np.eye(c_out, dtype=np.float32)

    wcat = np.concatenate(taps, axis=1)            # (c_out, K*c_in)
    return jnp.asarray(wcat), jnp.asarray(bias.reshape(c_out, 1)), offsets


def _pool_matrix(t_in, t_out):
    """Adaptive average pooling along time as a (t_in, t_out) matrix (numpy)."""
    P = np.zeros((t_in, t_out), np.float32)
    for o in range(t_out):
        s = (o * t_in) // t_out
        e = -((-(o + 1) * t_in) // t_out)          # ceil((o+1)*t_in / t_out)
        P[s:e, o] = 1.0 / (e - s)
    return P


def _block_diag(mat, n):
    r, c = mat.shape
    out = np.zeros((n * r, n * c), np.float32)
    for i in range(n):
        out[i * r:(i + 1) * r, i * c:(i + 1) * c] = mat
    return out


def _mask_row(t, batch, off):
    """0/1 f32 row (1, batch*t): 1 where the per-sample time index t+off stays in range."""
    tt = np.arange(batch * t) % t
    ok = ((tt + off) >= 0) & ((tt + off) < t)
    return jnp.asarray(ok.astype(np.float32).reshape(1, batch * t))


def prepare_fused(params, channels, kernel_size, timesteps, batch, latent_dim):
    c0 = channels[0]
    c_half = (c0 + 1) // 2
    ch = [c0 + c0 % 2] + list(channels[1:])        # channels after the concat adjustment

    rx_w, rx_b, red_offs = _fused_block_wcat(params["reduce_x"], c0, c_half,
                                             kernel_size, 1, 1)
    rdx_w, rdx_b, _ = _fused_block_wcat(params["reduce_dx"], c0, c_half,
                                        kernel_size, 1, 1)

    layer_arrays, layer_offs = [], []
    for i, lp in enumerate(params["layers"]):
        w, b, offs = _fused_block_wcat(lp["conv"], ch[i], ch[i + 1],
                                       kernel_size, lp["dilation"], 2)
        pool = jnp.asarray(_block_diag(_pool_matrix(timesteps[i], timesteps[i + 1]), batch))
        layer_arrays.append({"wcat": w, "bias": b, "pool": pool})
        layer_offs.append(offs)

    # Precomputed padding-mask rows per conv stage (avoids in-kernel iota/mod).
    n_stage = len(timesteps) - 1
    mask_offs = [set() for _ in range(n_stage)]
    mask_offs[0].update(int(o) for o in red_offs if o != 0)
    mask_offs[0].update({-1, 1})                   # needed by delta()
    for i, offs in enumerate(layer_offs):
        mask_offs[i].update(int(o) for o in offs if o != 0)
    masks = [{off: _mask_row(timesteps[i], batch, off) for off in sorted(s)}
             for i, s in enumerate(mask_offs)]

    # Flatten+Linear as per-channel block-diagonal (B*t_last, B*L) weights + tiled bias.
    fc = params["fc"]
    c_last, t_last = ch[-1], timesteps[-1]
    L = latent_dim
    W = np.asarray(fc["w_t"], np.float32)          # (c_last*t_last, L)
    wblk = np.zeros((c_last, batch * t_last, batch * L), np.float32)
    for c in range(c_last):
        blk = W[c * t_last:(c + 1) * t_last, :]
        for b in range(batch):
            wblk[c, b * t_last:(b + 1) * t_last, b * L:(b + 1) * L] = blk
    bias_blk = np.tile(np.asarray(fc["b"], np.float32).reshape(-1), batch).reshape(1, batch * L)

    arrays = {
        "reduce_x": {"wcat": rx_w, "bias": rx_b},
        "reduce_dx": {"wcat": rdx_w, "bias": rdx_b},
        "layers": layer_arrays,
        "masks": masks,
        "fc": {"wblk": jnp.asarray(wblk), "bias": jnp.asarray(bias_blk),
               "gamma": fc["gamma"], "beta": fc["beta"]},
    }
    meta = {"reduce_offsets": red_offs, "layer_offsets": layer_offs,
            "c_last": c_last, "t_last": t_last}
    return arrays, meta


# --------------------------------------------------------------------------- #
# Fused forward pass (one pallas_call)
# --------------------------------------------------------------------------- #
def build_skip_encoder(params, channels, kernel_size, timesteps, latent_dim, batch):
    arrays, meta = prepare_fused(params, channels, kernel_size, timesteps, batch, latent_dim)
    flat, treedef = jax.tree_util.tree_flatten(arrays)
    red_offs = meta["reduce_offsets"]
    layer_offs = meta["layer_offsets"]
    c_last = meta["c_last"]
    B, L = batch, latent_dim
    C0, T0 = channels[0], timesteps[0]

    @jax.jit
    def forward(x):
        assert x.shape == (B, C0, T0), x.shape

        def kernel(*refs):
            x_ref = refs[0]
            o_z, o_raw = refs[-2], refs[-1]
            p = jax.tree_util.tree_unflatten(treedef, refs[1:-2])

            # Preload the 0/1 padding-mask rows once (f32, (1, B*T_stage)).
            mrows = [{off: r[...] for off, r in stage.items()} for stage in p["masks"]]

            def shift_t(v, off, stage):
                # result[:, b*T+t] = v[:, b*T+t+off] if 0 <= t+off < T else 0
                if off == 0:
                    return v
                w = v.shape[-1]
                rolled = pltpu.roll(v, shift=(-off) % w, axis=1)
                return rolled * mrows[stage][off]

            def delta2d(v, stage):
                # dx[:, t] = 0.5*(v[:, t+1] - v[:, t-1]) inside each sample, 0 at both ends
                w = v.shape[-1]
                fwd = pltpu.roll(v, shift=w - 1, axis=1)   # v[:, j+1]
                bwd = pltpu.roll(v, shift=1, axis=1)       # v[:, j-1]
                interior = mrows[stage][1] * mrows[stage][-1]
                return (0.5 * (fwd - bwd)) * interior

            def res_conv(parts, col_ranges, wcat_ref, bias_ref, offsets, stage):
                # Fused ResidualBlock on a batch-wide (c_in, B*T) slab: grouped dilated
                # same-conv with the skip folded into the zero-offset tap; 2-D MXU dots.
                wcat = wcat_ref[...]
                bias = bias_ref[...]
                c_out = bias.shape[0]
                c_in = wcat.shape[1] // len(offsets)
                w = parts[0].shape[-1]
                acc = jnp.zeros((c_out, w), jnp.float32)
                for k, off in enumerate(offsets):
                    wk = wcat[:, k * c_in:(k + 1) * c_in]
                    for (lo, hi), part in zip(col_ranges, parts):
                        acc = acc + jnp.dot(wk[:, lo:hi], shift_t(part, off, stage),
                                            preferred_element_type=jnp.float32)
                return acc + bias

            x_all = x_ref[...]                                    # (C0, B*T0)
            rx = res_conv([x_all], [(0, C0)], p["reduce_x"]["wcat"],
                          p["reduce_x"]["bias"], red_offs, 0)
            rdx = res_conv([delta2d(x_all, 0)], [(0, C0)], p["reduce_dx"]["wcat"],
                           p["reduce_dx"]["bias"], red_offs, 0)

            # Channel concat folded into layer 0 via a column split of its weights.
            c_half = rx.shape[0]
            parts, col_ranges = [rx, rdx], [(0, c_half), (c_half, 2 * c_half)]
            h = None
            for li, layer in enumerate(p["layers"]):
                if li == 0:
                    conv = res_conv(parts, col_ranges, layer["wcat"], layer["bias"],
                                    layer_offs[li], li)
                else:
                    conv = res_conv([h], [(0, h.shape[0])], layer["wcat"], layer["bias"],
                                    layer_offs[li], li)
                # DownsampleTimesteps for the whole batch: one block-diag pool matmul.
                h = jnp.dot(conv, layer["pool"][...], preferred_element_type=jnp.float32)

            # Flatten(C,T) -> Linear for the whole batch: per-channel block-diag dots
            # producing one (1, B*L) row (batch lives on lanes).
            y_flat = p["fc"]["bias"][...]
            for c in range(c_last):
                y_flat = y_flat + jnp.dot(h[c:c + 1, :], p["fc"]["wblk"][c],
                                          preferred_element_type=jnp.float32)

            # BatchNorm1d (training-mode batch statistics, biased variance).
            ys = [y_flat[:, b * L:(b + 1) * L] for b in range(B)]
            inv_b = 1.0 / B
            mean = ys[0]
            for y in ys[1:]:
                mean = mean + y
            mean = mean * inv_b
            var = jnp.zeros_like(mean)
            for y in ys:
                var = var + jnp.square(y - mean)
            var = var * inv_b
            inv_std = lax.rsqrt(var + BN_EPS)
            gamma = p["fc"]["gamma"][...]
            beta = p["fc"]["beta"][...]
            for b in range(B):
                o_raw[b:b + 1, :] = ys[b].astype(o_raw.dtype)
                o_z[b:b + 1, :] = (gamma * ((ys[b] - mean) * inv_std)
                                   + beta).astype(o_z.dtype)

        # Layout plumbing outside the kernel: time+batch on lanes, channels on sublanes.
        x2d = jnp.transpose(x, (1, 0, 2)).reshape(C0, B * T0)
        z, y_raw = pl.pallas_call(
            kernel,
            out_shape=(jax.ShapeDtypeStruct((B, L), jnp.float32),
                       jax.ShapeDtypeStruct((B, L), jnp.float32)),
            in_specs=[VMEM_SPEC] * (1 + len(flat)),
            out_specs=(VMEM_SPEC, VMEM_SPEC),
        )(x2d, *flat)
        return z, y_raw

    return forward


# --------------------------------------------------------------------------- #
# Pure-JAX reference (independent of the kernel's fused/folded formulation)
# --------------------------------------------------------------------------- #
def reference_forward(params, x, timesteps):
    HIGH = lax.Precision.HIGHEST

    def conv_same(h, w, b, dilation=1, groups=1):
        c_out, _, k = w.shape
        pad = dilation * (k - 1) // 2
        out = lax.conv_general_dilated(
            h, w, window_strides=(1,), padding=[(pad, pad)],
            rhs_dilation=(dilation,), dimension_numbers=("NCH", "OIH", "NCH"),
            feature_group_count=groups, precision=HIGH)
        return out + b.reshape(1, c_out, 1)

    def res_block(h, p, dilation=1, groups=1):
        y = conv_same(h, p["w"], p["b"], dilation, groups)
        skip = conv_same(h, p["proj_w"], p["proj_b"]) if "proj_w" in p else h
        return y + skip

    dx = 0.5 * (x[..., 2:] - x[..., :-2])
    dx = jnp.pad(dx, ((0, 0), (0, 0), (1, 1)))
    h = jnp.concatenate([res_block(x, params["reduce_x"]),
                         res_block(dx, params["reduce_dx"])], axis=1)
    for i, layer in enumerate(params["layers"]):
        h = res_block(h, layer["conv"], layer["dilation"], groups=2)
        P = jnp.asarray(_pool_matrix(timesteps[i], timesteps[i + 1]))
        h = jnp.einsum("bct,to->bco", h, P, precision=HIGH)

    B = h.shape[0]
    flat = h.reshape(B, -1)
    fc = params["fc"]
    y_raw = jnp.dot(flat, fc["w_t"], precision=HIGH) + fc["b"]
    mean = jnp.mean(y_raw, axis=0, keepdims=True)
    var = jnp.mean(jnp.square(y_raw - mean), axis=0, keepdims=True)
    z = fc["gamma"] * ((y_raw - mean) * lax.rsqrt(var + BN_EPS)) + fc["beta"]
    return z, y_raw


# --------------------------------------------------------------------------- #
if __name__ == "__main__":
    key = jax.random.PRNGKey(0)
    kx, kp = jax.random.split(key)

    latent_dim = 32
    channels = [3, 8, 16]          # channels[0]=3 -> reduce blocks output 2 each -> concat 4
    timesteps = [16, 8, 4]
    kernel_size = 3
    batch = 2

    x = jax.random.normal(kx, (batch, channels[0], timesteps[0]), jnp.float32)
    params = init_skip_encoder(kp, latent_dim, channels, kernel_size, timesteps)

    forward = build_skip_encoder(params, channels, kernel_size, timesteps, latent_dim, batch)
    z, y_raw = forward(x)
    jax.block_until_ready(z)

    assert z.shape == (batch, latent_dim), z.shape
    assert bool(jnp.all(jnp.isfinite(z)))

    # Validate the fused pipeline (delta/conv/pool/FC) against an independent lax reference.
    _, y_ref = reference_forward(params, x, timesteps)
    np.testing.assert_allclose(np.asarray(y_raw), np.asarray(y_ref),
                               atol=5e-2, rtol=5e-2)

    # Validate the in-kernel BatchNorm against numpy applied to the kernel's own pre-BN output.
    yk = np.asarray(y_raw, np.float32)
    mean = yk.mean(axis=0, keepdims=True)
    var = ((yk - mean) ** 2).mean(axis=0, keepdims=True)
    z_expect = (np.asarray(params["fc"]["gamma"]) * (yk - mean) / np.sqrt(var + BN_EPS)
                + np.asarray(params["fc"]["beta"]))
    np.testing.assert_allclose(np.asarray(z), z_expect, atol=1e-2, rtol=1e-2)

    print("KERNEL_OK")
</pallas_src>

<mosaic_0001>
module attributes {stable_mosaic.version = 11 : i64} {
  func.func @kernel(%arg0: memref<3x32xf32, #tpu.memory_space<vmem>>, %arg1: memref<1x32xf32, #tpu.memory_space<vmem>>, %arg2: memref<1x64xf32, #tpu.memory_space<vmem>>, %arg3: memref<1x32xf32, #tpu.memory_space<vmem>>, %arg4: memref<16x8x64xf32, #tpu.memory_space<vmem>>, %arg5: memref<8x1xf32, #tpu.memory_space<vmem>>, %arg6: memref<32x16xf32, #tpu.memory_space<vmem>>, %arg7: memref<8x12xf32, #tpu.memory_space<vmem>>, %arg8: memref<16x1xf32, #tpu.memory_space<vmem>>, %arg9: memref<16x8xf32, #tpu.memory_space<vmem>>, %arg10: memref<16x24xf32, #tpu.memory_space<vmem>>, %arg11: memref<1x32xf32, #tpu.memory_space<vmem>>, %arg12: memref<1x32xf32, #tpu.memory_space<vmem>>, %arg13: memref<1x16xf32, #tpu.memory_space<vmem>>, %arg14: memref<1x16xf32, #tpu.memory_space<vmem>>, %arg15: memref<2x1xf32, #tpu.memory_space<vmem>>, %arg16: memref<2x9xf32, #tpu.memory_space<vmem>>, %arg17: memref<2x1xf32, #tpu.memory_space<vmem>>, %arg18: memref<2x9xf32, #tpu.memory_space<vmem>>, %arg19: memref<2x32xf32, #tpu.memory_space<vmem>>, %arg20: memref<2x32xf32, #tpu.memory_space<vmem>>) attributes {dimension_semantics = [], scalar_prefetch = 0 : i64, scratch_operands = 0 : i64, tpu.core_type = #tpu.core_type<tc>} {
    %c0 = arith.constant 0 : index
    %c0_0 = arith.constant 0 : index
    %0 = vector.load %arg11[%c0, %c0_0] : memref<1x32xf32, #tpu.memory_space<vmem>>, vector<1x32xf32>
    %c0_1 = arith.constant 0 : index
    %c0_2 = arith.constant 0 : index
    %1 = vector.load %arg12[%c0_1, %c0_2] : memref<1x32xf32, #tpu.memory_space<vmem>>, vector<1x32xf32>
    %c0_3 = arith.constant 0 : index
    %c0_4 = arith.constant 0 : index
    %2 = vector.load %arg13[%c0_3, %c0_4] : memref<1x16xf32, #tpu.memory_space<vmem>>, vector<1x16xf32>
    %c0_5 = arith.constant 0 : index
    %c0_6 = arith.constant 0 : index
    %3 = vector.load %arg14[%c0_5, %c0_6] : memref<1x16xf32, #tpu.memory_space<vmem>>, vector<1x16xf32>
    %c0_7 = arith.constant 0 : index
    %c0_8 = arith.constant 0 : index
    %4 = vector.load %arg0[%c0_7, %c0_8] : memref<3x32xf32, #tpu.memory_space<vmem>>, vector<3x32xf32>
    %c0_9 = arith.constant 0 : index
    %c0_10 = arith.constant 0 : index
    %5 = vector.load %arg18[%c0_9, %c0_10] : memref<2x9xf32, #tpu.memory_space<vmem>>, vector<2x9xf32>
    %c0_11 = arith.constant 0 : index
    %c0_12 = arith.constant 0 : index
    %6 = vector.load %arg17[%c0_11, %c0_12] : memref<2x1xf32, #tpu.memory_space<vmem>>, vector<2x1xf32>
    %cst = arith.constant 0.000000e+00 : f32
    %7 = vector.broadcast %cst : f32 to vector<2x32xf32>
    %8 = vector.extract_strided_slice %5 {offsets = [0, 0], sizes = [2, 3], strides = [1, 1]} : vector<2x9xf32> to vector<2x3xf32>
    %c1_i32 = arith.constant 1 : i32
    %9 = tpu.dynamic_rotate %4 by %c1_i32 dim 1 : vector<3x32xf32>, i32 -> vector<3x32xf32>
    %10 = vector.broadcast %0 : vector<1x32xf32> to vector<3x32xf32>
    %11 = arith.mulf %9, %10 : vector<3x32xf32>
    %cst_13 = arith.constant dense<0.000000e+00> : vector<2x32xf32>
    %12 = tpu.matmul %8, %11, %cst_13 {dimension_numbers = #tpu.dot_dimension_numbers<[1], [0], [0], [1], [0, 0, 1, 1], [], []>} : vector<2x3xf32>, vector<3x32xf32>, vector<2x32xf32> -> vector<2x32xf32>
    %13 = arith.addf %7, %12 : vector<2x32xf32>
    %14 = vector.extract_strided_slice %5 {offsets = [0, 3], sizes = [2, 3], strides = [1, 1]} : vector<2x9xf32> to vector<2x3xf32>
    %cst_14 = arith.constant dense<0.000000e+00> : vector<2x32xf32>
    %15 = tpu.matmul %14, %4, %cst_14 {dimension_numbers = #tpu.dot_dimension_numbers<[1], [0], [0], [1], [0, 0, 1, 1], [], []>} : vector<2x3xf32>, vector<3x32xf32>, vector<2x32xf32> -> vector<2x32xf32>
    %16 = arith.addf %13, %15 : vector<2x32xf32>
    %17 = vector.extract_strided_slice %5 {offsets = [0, 6], sizes = [2, 3], strides = [1, 1]} : vector<2x9xf32> to vector<2x3xf32>
    %c31_i32 = arith.constant 31 : i32
    %18 = tpu.dynamic_rotate %4 by %c31_i32 dim 1 : vector<3x32xf32>, i32 -> vector<3x32xf32>
    %19 = vector.broadcast %1 : vector<1x32xf32> to vector<3x32xf32>
    %20 = arith.mulf %18, %19 : vector<3x32xf32>
    %cst_15 = arith.constant dense<0.000000e+00> : vector<2x32xf32>
    %21 = tpu.matmul %17, %20, %cst_15 {dimension_numbers = #tpu.dot_dimension_numbers<[1], [0], [0], [1], [0, 0, 1, 1], [], []>} : vector<2x3xf32>, vector<3x32xf32>, vector<2x32xf32> -> vector<2x32xf32>
    %22 = arith.addf %16, %21 : vector<2x32xf32>
    %23 = vector.broadcast %6 : vector<2x1xf32> to vector<2x32xf32>
    %24 = arith.addf %22, %23 : vector<2x32xf32>
    %c31_i32_16 = arith.constant 31 : i32
    %25 = tpu.dynamic_rotate %4 by %c31_i32_16 dim 1 : vector<3x32xf32>, i32 -> vector<3x32xf32>
    %c1_i32_17 = arith.constant 1 : i32
    %26 = tpu.dynamic_rotate %4 by %c1_i32_17 dim 1 : vector<3x32xf32>, i32 -> vector<3x32xf32>
    %27 = arith.mulf %1, %0 : vector<1x32xf32>
    %28 = arith.subf %25, %26 : vector<3x32xf32>
    %cst_18 = arith.constant 5.000000e-01 : f32
    %29 = vector.broadcast %cst_18 : f32 to vector<3x32xf32>
    %30 = arith.mulf %29, %28 : vector<3x32xf32>
    %31 = vector.broadcast %27 : vector<1x32xf32> to vector<3x32xf32>
    %32 = arith.mulf %30, %31 : vector<3x32xf32>
    %c0_19 = arith.constant 0 : index
    %c0_20 = arith.constant 0 : index
    %33 = vector.load %arg16[%c0_19, %c0_20] : memref<2x9xf32, #tpu.memory_space<vmem>>, vector<2x9xf32>
    %c0_21 = arith.constant 0 : index
    %c0_22 = arith.constant 0 : index
    %34 = vector.load %arg15[%c0_21, %c0_22] : memref<2x1xf32, #tpu.memory_space<vmem>>, vector<2x1xf32>
    %cst_23 = arith.constant 0.000000e+00 : f32
    %35 = vector.broadcast %cst_23 : f32 to vector<2x32xf32>
    %36 = vector.extract_strided_slice %33 {offsets = [0, 0], sizes = [2, 3], strides = [1, 1]} : vector<2x9xf32> to vector<2x3xf32>
    %c1_i32_24 = arith.constant 1 : i32
    %37 = tpu.dynamic_rotate %32 by %c1_i32_24 dim 1 : vector<3x32xf32>, i32 -> vector<3x32xf32>
    %38 = vector.broadcast %0 : vector<1x32xf32> to vector<3x32xf32>
    %39 = arith.mulf %37, %38 : vector<3x32xf32>
    %cst_25 = arith.constant dense<0.000000e+00> : vector<2x32xf32>
    %40 = tpu.matmul %36, %39, %cst_25 {dimension_numbers = #tpu.dot_dimension_numbers<[1], [0], [0], [1], [0, 0, 1, 1], [], []>} : vector<2x3xf32>, vector<3x32xf32>, vector<2x32xf32> -> vector<2x32xf32>
    %41 = arith.addf %35, %40 : vector<2x32xf32>
    %42 = vector.extract_strided_slice %33 {offsets = [0, 3], sizes = [2, 3], strides = [1, 1]} : vector<2x9xf32> to vector<2x3xf32>
    %cst_26 = arith.constant dense<0.000000e+00> : vector<2x32xf32>
    %43 = tpu.matmul %42, %32, %cst_26 {dimension_numbers = #tpu.dot_dimension_numbers<[1], [0], [0], [1], [0, 0, 1, 1], [], []>} : vector<2x3xf32>, vector<3x32xf32>, vector<2x32xf32> -> vector<2x32xf32>
    %44 = arith.addf %41, %43 : vector<2x32xf32>
    %45 = vector.extract_strided_slice %33 {offsets = [0, 6], sizes = [2, 3], strides = [1, 1]} : vector<2x9xf32> to vector<2x3xf32>
    %c31_i32_27 = arith.constant 31 : i32
    %46 = tpu.dynamic_rotate %32 by %c31_i32_27 dim 1 : vector<3x32xf32>, i32 -> vector<3x32xf32>
    %47 = vector.broadcast %1 : vector<1x32xf32> to vector<3x32xf32>
    %48 = arith.mulf %46, %47 : vector<3x32xf32>
    %cst_28 = arith.constant dense<0.000000e+00> : vector<2x32xf32>
    %49 = tpu.matmul %45, %48, %cst_28 {dimension_numbers = #tpu.dot_dimension_numbers<[1], [0], [0], [1], [0, 0, 1, 1], [], []>} : vector<2x3xf32>, vector<3x32xf32>, vector<2x32xf32> -> vector<2x32xf32>
    %50 = arith.addf %44, %49 : vector<2x32xf32>
    %51 = vector.broadcast %34 : vector<2x1xf32> to vector<2x32xf32>
    %52 = arith.addf %50, %51 : vector<2x32xf32>
    %c0_29 = arith.constant 0 : index
    %c0_30 = arith.constant 0 : index
    %53 = vector.load %arg7[%c0_29, %c0_30] : memref<8x12xf32, #tpu.memory_space<vmem>>, vector<8x12xf32>
    %c0_31 = arith.constant 0 : index
    %c0_32 = arith.constant 0 : index
    %54 = vector.load %arg5[%c0_31, %c0_32] : memref<8x1xf32, #tpu.memory_space<vmem>>, vector<8x1xf32>
    %cst_33 = arith.constant 0.000000e+00 : f32
    %55 = vector.broadcast %cst_33 : f32 to vector<8x32xf32>
    %56 = vector.extract_strided_slice %53 {offsets = [0, 0], sizes = [8, 4], strides = [1, 1]} : vector<8x12xf32> to vector<8x4xf32>
    %57 = vector.extract_strided_slice %56 {offsets = [0, 0], sizes = [8, 2], strides = [1, 1]} : vector<8x4xf32> to vector<8x2xf32>
    %c1_i32_34 = arith.constant 1 : i32
    %58 = tpu.dynamic_rotate %24 by %c1_i32_34 dim 1 : vector<2x32xf32>, i32 -> vector<2x32xf32>
    %59 = vector.broadcast %0 : vector<1x32xf32> to vector<2x32xf32>
    %60 = arith.mulf %58, %59 : vector<2x32xf32>
    %cst_35 = arith.constant dense<0.000000e+00> : vector<8x32xf32>
    %61 = tpu.matmul %57, %60, %cst_35 {dimension_numbers = #tpu.dot_dimension_numbers<[1], [0], [0], [1], [0, 0, 1, 1], [], []>} : vector<8x2xf32>, vector<2x32xf32>, vector<8x32xf32> -> vector<8x32xf32>
    %62 = arith.addf %55, %61 : vector<8x32xf32>
    %63 = vector.extract_strided_slice %56 {offsets = [0, 2], sizes = [8, 2], strides = [1, 1]} : vector<8x4xf32> to vector<8x2xf32>
    %c1_i32_36 = arith.constant 1 : i32
    %64 = tpu.dynamic_rotate %52 by %c1_i32_36 dim 1 : vector<2x32xf32>, i32 -> vector<2x32xf32>
    %65 = vector.broadcast %0 : vector<1x32xf32> to vector<2x32xf32>
    %66 = arith.mulf %64, %65 : vector<2x32xf32>
    %cst_37 = arith.constant dense<0.000000e+00> : vector<8x32xf32>
    %67 = tpu.matmul %63, %66, %cst_37 {dimension_numbers = #tpu.dot_dimension_numbers<[1], [0], [0], [1], [0, 0, 1, 1], [], []>} : vector<8x2xf32>, vector<2x32xf32>, vector<8x32xf32> -> vector<8x32xf32>
    %68 = arith.addf %62, %67 : vector<8x32xf32>
    %69 = vector.extract_strided_slice %53 {offsets = [0, 4], sizes = [8, 4], strides = [1, 1]} : vector<8x12xf32> to vector<8x4xf32>
    %70 = vector.extract_strided_slice %69 {offsets = [0, 0], sizes = [8, 2], strides = [1, 1]} : vector<8x4xf32> to vector<8x2xf32>
    %cst_38 = arith.constant dense<0.000000e+00> : vector<8x32xf32>
    %71 = tpu.matmul %70, %24, %cst_38 {dimension_numbers = #tpu.dot_dimension_numbers<[1], [0], [0], [1], [0, 0, 1, 1], [], []>} : vector<8x2xf32>, vector<2x32xf32>, vector<8x32xf32> -> vector<8x32xf32>
    %72 = arith.addf %68, %71 : vector<8x32xf32>
    %73 = vector.extract_strided_slice %69 {offsets = [0, 2], sizes = [8, 2], strides = [1, 1]} : vector<8x4xf32> to vector<8x2xf32>
    %cst_39 = arith.constant dense<0.000000e+00> : vector<8x32xf32>
    %74 = tpu.matmul %73, %52, %cst_39 {dimension_numbers = #tpu.dot_dimension_numbers<[1], [0], [0], [1], [0, 0, 1, 1], [], []>} : vector<8x2xf32>, vector<2x32xf32>, vector<8x32xf32> -> vector<8x32xf32>
    %75 = arith.addf %72, %74 : vector<8x32xf32>
    %76 = vector.extract_strided_slice %53 {offsets = [0, 8], sizes = [8, 4], strides = [1, 1]} : vector<8x12xf32> to vector<8x4xf32>
    %77 = vector.extract_strided_slice %76 {offsets = [0, 0], sizes = [8, 2], strides = [1, 1]} : vector<8x4xf32> to vector<8x2xf32>
    %c31_i32_40 = arith.constant 31 : i32
    %78 = tpu.dynamic_rotate %24 by %c31_i32_40 dim 1 : vector<2x32xf32>, i32 -> vector<2x32xf32>
    %79 = vector.broadcast %1 : vector<1x32xf32> to vector<2x32xf32>
    %80 = arith.mulf %78, %79 : vector<2x32xf32>
    %cst_41 = arith.constant dense<0.000000e+00> : vector<8x32xf32>
    %81 = tpu.matmul %77, %80, %cst_41 {dimension_numbers = #tpu.dot_dimension_numbers<[1], [0], [0], [1], [0, 0, 1, 1], [], []>} : vector<8x2xf32>, vector<2x32xf32>, vector<8x32xf32> -> vector<8x32xf32>
    %82 = arith.addf %75, %81 : vector<8x32xf32>
    %83 = vector.extract_strided_slice %76 {offsets = [0, 2], sizes = [8, 2], strides = [1, 1]} : vector<8x4xf32> to vector<8x2xf32>
    %c31_i32_42 = arith.constant 31 : i32
    %84 = tpu.dynamic_rotate %52 by %c31_i32_42 dim 1 : vector<2x32xf32>, i32 -> vector<2x32xf32>
    %85 = vector.broadcast %1 : vector<1x32xf32> to vector<2x32xf32>
    %86 = arith.mulf %84, %85 : vector<2x32xf32>
    %cst_43 = arith.constant dense<0.000000e+00> : vector<8x32xf32>
    %87 = tpu.matmul %83, %86, %cst_43 {dimension_numbers = #tpu.dot_dimension_numbers<[1], [0], [0], [1], [0, 0, 1, 1], [], []>} : vector<8x2xf32>, vector<2x32xf32>, vector<8x32xf32> -> vector<8x32xf32>
    %88 = arith.addf %82, %87 : vector<8x32xf32>
    %89 = vector.broadcast %54 : vector<8x1xf32> to vector<8x32xf32>
    %90 = arith.addf %88, %89 : vector<8x32xf32>
    %c0_44 = arith.constant 0 : index
    %c0_45 = arith.constant 0 : index
    %91 = vector.load %arg6[%c0_44, %c0_45] : memref<32x16xf32, #tpu.memory_space<vmem>>, vector<32x16xf32>
    %cst_46 = arith.constant dense<0.000000e+00> : vector<8x16xf32>
    %92 = tpu.matmul %90, %91, %cst_46 {dimension_numbers = #tpu.dot_dimension_numbers<[1], [0], [0], [1], [0, 0, 1, 1], [], []>} : vector<8x32xf32>, vector<32x16xf32>, vector<8x16xf32> -> vector<8x16xf32>
    %c0_47 = arith.constant 0 : index
    %c0_48 = arith.constant 0 : index
    %93 = vector.load %arg10[%c0_47, %c0_48] : memref<16x24xf32, #tpu.memory_space<vmem>>, vector<16x24xf32>
    %c0_49 = arith.constant 0 : index
    %c0_50 = arith.constant 0 : index
    %94 = vector.load %arg8[%c0_49, %c0_50] : memref<16x1xf32, #tpu.memory_space<vmem>>, vector<16x1xf32>
    %cst_51 = arith.constant 0.000000e+00 : f32
    %95 = vector.broadcast %cst_51 : f32 to vector<16x16xf32>
    %96 = vector.extract_strided_slice %93 {offsets = [0, 0], sizes = [16, 8], strides = [1, 1]} : vector<16x24xf32> to vector<16x8xf32>
    %c2_i32 = arith.constant 2 : i32
    %97 = tpu.dynamic_rotate %92 by %c2_i32 dim 1 : vector<8x16xf32>, i32 -> vector<8x16xf32>
    %98 = vector.broadcast %2 : vector<1x16xf32> to vector<8x16xf32>
    %99 = arith.mulf %97, %98 : vector<8x16xf32>
    %cst_52 = arith.constant dense<0.000000e+00> : vector<16x16xf32>
    %100 = tpu.matmul %96, %99, %cst_52 {dimension_numbers = #tpu.dot_dimension_numbers<[1], [0], [0], [1], [0, 0, 1, 1], [], []>} : vector<16x8xf32>, vector<8x16xf32>, vector<16x16xf32> -> vector<16x16xf32>
    %101 = arith.addf %95, %100 : vector<16x16xf32>
    %102 = vector.extract_strided_slice %93 {offsets = [0, 8], sizes = [16, 8], strides = [1, 1]} : vector<16x24xf32> to vector<16x8xf32>
    %cst_53 = arith.constant dense<0.000000e+00> : vector<16x16xf32>
    %103 = tpu.matmul %102, %92, %cst_53 {dimension_numbers = #tpu.dot_dimension_numbers<[1], [0], [0], [1], [0, 0, 1, 1], [], []>} : vector<16x8xf32>, vector<8x16xf32>, vector<16x16xf32> -> vector<16x16xf32>
    %104 = arith.addf %101, %103 : vector<16x16xf32>
    %105 = vector.extract_strided_slice %93 {offsets = [0, 16], sizes = [16, 8], strides = [1, 1]} : vector<16x24xf32> to vector<16x8xf32>
    %c14_i32 = arith.constant 14 : i32
    %106 = tpu.dynamic_rotate %92 by %c14_i32 dim 1 : vector<8x16xf32>, i32 -> vector<8x16xf32>
    %107 = vector.broadcast %3 : vector<1x16xf32> to vector<8x16xf32>
    %108 = arith.mulf %106, %107 : vector<8x16xf32>
    %cst_54 = arith.constant dense<0.000000e+00> : vector<16x16xf32>
    %109 = tpu.matmul %105, %108, %cst_54 {dimension_numbers = #tpu.dot_dimension_numbers<[1], [0], [0], [1], [0, 0, 1, 1], [], []>} : vector<16x8xf32>, vector<8x16xf32>, vector<16x16xf32> -> vector<16x16xf32>
    %110 = arith.addf %104, %109 : vector<16x16xf32>
    %111 = vector.broadcast %94 : vector<16x1xf32> to vector<16x16xf32>
    %112 = arith.addf %110, %111 : vector<16x16xf32>
    %c0_55 = arith.constant 0 : index
    %c0_56 = arith.constant 0 : index
    %113 = vector.load %arg9[%c0_55, %c0_56] : memref<16x8xf32, #tpu.memory_space<vmem>>, vector<16x8xf32>
    %cst_57 = arith.constant dense<0.000000e+00> : vector<16x8xf32>
    %114 = tpu.matmul %112, %113, %cst_57 {dimension_numbers = #tpu.dot_dimension_numbers<[1], [0], [0], [1], [0, 0, 1, 1], [], []>} : vector<16x16xf32>, vector<16x8xf32>, vector<16x8xf32> -> vector<16x8xf32>
    %c0_58 = arith.constant 0 : index
    %c0_59 = arith.constant 0 : index
    %115 = vector.load %arg2[%c0_58, %c0_59] : memref<1x64xf32, #tpu.memory_space<vmem>>, vector<1x64xf32>
    %116 = vector.extract_strided_slice %114 {offsets = [0, 0], sizes = [1, 8], strides = [1, 1]} : vector<16x8xf32> to vector<1x8xf32>
    %c0_60 = arith.constant 0 : index
    %c0_61 = arith.constant 0 : index
    %c0_62 = arith.constant 0 : index
    %117 = vector.load %arg4[%c0_60, %c0_61, %c0_62] : memref<16x8x64xf32, #tpu.memory_space<vmem>>, vector<1x8x64xf32>
    %118 = vector.shape_cast %117 : vector<1x8x64xf32> to vector<8x64xf32>
    %cst_63 = arith.constant dense<0.000000e+00> : vector<1x64xf32>
    %119 = tpu.matmul %116, %118, %cst_63 {dimension_numbers = #tpu.dot_dimension_numbers<[1], [0], [0], [1], [0, 0, 1, 1], [], []>} : vector<1x8xf32>, vector<8x64xf32>, vector<1x64xf32> -> vector<1x64xf32>
    %120 = arith.addf %115, %119 : vector<1x64xf32>
    %121 = vector.extract_strided_slice %114 {offsets = [1, 0], sizes = [1, 8], strides = [1, 1]} : vector<16x8xf32> to vector<1x8xf32>
    %c1 = arith.constant 1 : index
    %c0_64 = arith.constant 0 : index
    %c0_65 = arith.constant 0 : index
    %122 = vector.load %arg4[%c1, %c0_64, %c0_65] : memref<16x8x64xf32, #tpu.memory_space<vmem>>, vector<1x8x64xf32>
    %123 = vector.shape_cast %122 : vector<1x8x64xf32> to vector<8x64xf32>
    %cst_66 = arith.constant dense<0.000000e+00> : vector<1x64xf32>
    %124 = tpu.matmul %121, %123, %cst_66 {dimension_numbers = #tpu.dot_dimension_numbers<[1], [0], [0], [1], [0, 0, 1, 1], [], []>} : vector<1x8xf32>, vector<8x64xf32>, vector<1x64xf32> -> vector<1x64xf32>
    %125 = arith.addf %120, %124 : vector<1x64xf32>
    %126 = vector.extract_strided_slice %114 {offsets = [2, 0], sizes = [1, 8], strides = [1, 1]} : vector<16x8xf32> to vector<1x8xf32>
    %c2 = arith.constant 2 : index
    %c0_67 = arith.constant 0 : index
    %c0_68 = arith.constant 0 : index
    %127 = vector.load %arg4[%c2, %c0_67, %c0_68] : memref<16x8x64xf32, #tpu.memory_space<vmem>>, vector<1x8x64xf32>
    %128 = vector.shape_cast %127 : vector<1x8x64xf32> to vector<8x64xf32>
    %cst_69 = arith.constant dense<0.000000e+00> : vector<1x64xf32>
    %129 = tpu.matmul %126, %128, %cst_69 {dimension_numbers = #tpu.dot_dimension_numbers<[1], [0], [0], [1], [0, 0, 1, 1], [], []>} : vector<1x8xf32>, vector<8x64xf32>, vector<1x64xf32> -> vector<1x64xf32>
    %130 = arith.addf %125, %129 : vector<1x64xf32>
    %131 = vector.extract_strided_slice %114 {offsets = [3, 0], sizes = [1, 8], strides = [1, 1]} : vector<16x8xf32> to vector<1x8xf32>
    %c3 = arith.constant 3 : index
    %c0_70 = arith.constant 0 : index
    %c0_71 = arith.constant 0 : index
    %132 = vector.load %arg4[%c3, %c0_70, %c0_71] : memref<16x8x64xf32, #tpu.memory_space<vmem>>, vector<1x8x64xf32>
    %133 = vector.shape_cast %132 : vector<1x8x64xf32> to vector<8x64xf32>
    %cst_72 = arith.constant dense<0.000000e+00> : vector<1x64xf32>
    %134 = tpu.matmul %131, %133, %cst_72 {dimension_numbers = #tpu.dot_dimension_numbers<[1], [0], [0], [1], [0, 0, 1, 1], [], []>} : vector<1x8xf32>, vector<8x64xf32>, vector<1x64xf32> -> vector<1x64xf32>
    %135 = arith.addf %130, %134 : vector<1x64xf32>
    %136 = vector.extract_strided_slice %114 {offsets = [4, 0], sizes = [1, 8], strides = [1, 1]} : vector<16x8xf32> to vector<1x8xf32>
    %c4 = arith.constant 4 : index
    %c0_73 = arith.constant 0 : index
    %c0_74 = arith.constant 0 : index
    %137 = vector.load %arg4[%c4, %c0_73, %c0_74] : memref<16x8x64xf32, #tpu.memory_space<vmem>>, vector<1x8x64xf32>
    %138 = vector.shape_cast %137 : vector<1x8x64xf32> to vector<8x64xf32>
    %cst_75 = arith.constant dense<0.000000e+00> : vector<1x64xf32>
    %139 = tpu.matmul %136, %138, %cst_75 {dimension_numbers = #tpu.dot_dimension_numbers<[1], [0], [0], [1], [0, 0, 1, 1], [], []>} : vector<1x8xf32>, vector<8x64xf32>, vector<1x64xf32> -> vector<1x64xf32>
    %140 = arith.addf %135, %139 : vector<1x64xf32>
    %141 = vector.extract_strided_slice %114 {offsets = [5, 0], sizes = [1, 8], strides = [1, 1]} : vector<16x8xf32> to vector<1x8xf32>
    %c5 = arith.constant 5 : index
    %c0_76 = arith.constant 0 : index
    %c0_77 = arith.constant 0 : index
    %142 = vector.load %arg4[%c5, %c0_76, %c0_77] : memref<16x8x64xf32, #tpu.memory_space<vmem>>, vector<1x8x64xf32>
    %143 = vector.shape_cast %142 : vector<1x8x64xf32> to vector<8x64xf32>
    %cst_78 = arith.constant dense<0.000000e+00> : vector<1x64xf32>
    %144 = tpu.matmul %141, %143, %cst_78 {dimension_numbers = #tpu.dot_dimension_numbers<[1], [0], [0], [1], [0, 0, 1, 1], [], []>} : vector<1x8xf32>, vector<8x64xf32>, vector<1x64xf32> -> vector<1x64xf32>
    %145 = arith.addf %140, %144 : vector<1x64xf32>
    %146 = vector.extract_strided_slice %114 {offsets = [6, 0], sizes = [1, 8], strides = [1, 1]} : vector<16x8xf32> to vector<1x8xf32>
    %c6 = arith.constant 6 : index
    %c0_79 = arith.constant 0 : index
    %c0_80 = arith.constant 0 : index
    %147 = vector.load %arg4[%c6, %c0_79, %c0_80] : memref<16x8x64xf32, #tpu.memory_space<vmem>>, vector<1x8x64xf32>
    %148 = vector.shape_cast %147 : vector<1x8x64xf32> to vector<8x64xf32>
    %cst_81 = arith.constant dense<0.000000e+00> : vector<1x64xf32>
    %149 = tpu.matmul %146, %148, %cst_81 {dimension_numbers = #tpu.dot_dimension_numbers<[1], [0], [0], [1], [0, 0, 1, 1], [], []>} : vector<1x8xf32>, vector<8x64xf32>, vector<1x64xf32> -> vector<1x64xf32>
    %150 = arith.addf %145, %149 : vector<1x64xf32>
    %151 = vector.extract_strided_slice %114 {offsets = [7, 0], sizes = [1, 8], strides = [1, 1]} : vector<16x8xf32> to vector<1x8xf32>
    %c7 = arith.constant 7 : index
    %c0_82 = arith.constant 0 : index
    %c0_83 = arith.constant 0 : index
    %152 = vector.load %arg4[%c7, %c0_82, %c0_83] : memref<16x8x64xf32, #tpu.memory_space<vmem>>, vector<1x8x64xf32>
    %153 = vector.shape_cast %152 : vector<1x8x64xf32> to vector<8x64xf32>
    %cst_84 = arith.constant dense<0.000000e+00> : vector<1x64xf32>
    %154 = tpu.matmul %151, %153, %cst_84 {dimension_numbers = #tpu.dot_dimension_numbers<[1], [0], [0], [1], [0, 0, 1, 1], [], []>} : vector<1x8xf32>, vector<8x64xf32>, vector<1x64xf32> -> vector<1x64xf32>
    %155 = arith.addf %150, %154 : vector<1x64xf32>
    %156 = vector.extract_strided_slice %114 {offsets = [8, 0], sizes = [1, 8], strides = [1, 1]} : vector<16x8xf32> to vector<1x8xf32>
    %c8 = arith.constant 8 : index
    %c0_85 = arith.constant 0 : index
    %c0_86 = arith.constant 0 : index
    %157 = vector.load %arg4[%c8, %c0_85, %c0_86] : memref<16x8x64xf32, #tpu.memory_space<vmem>>, vector<1x8x64xf32>
    %158 = vector.shape_cast %157 : vector<1x8x64xf32> to vector<8x64xf32>
    %cst_87 = arith.constant dense<0.000000e+00> : vector<1x64xf32>
    %159 = tpu.matmul %156, %158, %cst_87 {dimension_numbers = #tpu.dot_dimension_numbers<[1], [0], [0], [1], [0, 0, 1, 1], [], []>} : vector<1x8xf32>, vector<8x64xf32>, vector<1x64xf32> -> vector<1x64xf32>
    %160 = arith.addf %155, %159 : vector<1x64xf32>
    %161 = vector.extract_strided_slice %114 {offsets = [9, 0], sizes = [1, 8], strides = [1, 1]} : vector<16x8xf32> to vector<1x8xf32>
    %c9 = arith.constant 9 : index
    %c0_88 = arith.constant 0 : index
    %c0_89 = arith.constant 0 : index
    %162 = vector.load %arg4[%c9, %c0_88, %c0_89] : memref<16x8x64xf32, #tpu.memory_space<vmem>>, vector<1x8x64xf32>
    %163 = vector.shape_cast %162 : vector<1x8x64xf32> to vector<8x64xf32>
    %cst_90 = arith.constant dense<0.000000e+00> : vector<1x64xf32>
    %164 = tpu.matmul %161, %163, %cst_90 {dimension_numbers = #tpu.dot_dimension_numbers<[1], [0], [0], [1], [0, 0, 1, 1], [], []>} : vector<1x8xf32>, vector<8x64xf32>, vector<1x64xf32> -> vector<1x64xf32>
    %165 = arith.addf %160, %164 : vector<1x64xf32>
    %166 = vector.extract_strided_slice %114 {offsets = [10, 0], sizes = [1, 8], strides = [1, 1]} : vector<16x8xf32> to vector<1x8xf32>
    %c10 = arith.constant 10 : index
    %c0_91 = arith.constant 0 : index
    %c0_92 = arith.constant 0 : index
    %167 = vector.load %arg4[%c10, %c0_91, %c0_92] : memref<16x8x64xf32, #tpu.memory_space<vmem>>, vector<1x8x64xf32>
    %168 = vector.shape_cast %167 : vector<1x8x64xf32> to vector<8x64xf32>
    %cst_93 = arith.constant dense<0.000000e+00> : vector<1x64xf32>
    %169 = tpu.matmul %166, %168, %cst_93 {dimension_numbers = #tpu.dot_dimension_numbers<[1], [0], [0], [1], [0, 0, 1, 1], [], []>} : vector<1x8xf32>, vector<8x64xf32>, vector<1x64xf32> -> vector<1x64xf32>
    %170 = arith.addf %165, %169 : vector<1x64xf32>
    %171 = vector.extract_strided_slice %114 {offsets = [11, 0], sizes = [1, 8], strides = [1, 1]} : vector<16x8xf32> to vector<1x8xf32>
    %c11 = arith.constant 11 : index
    %c0_94 = arith.constant 0 : index
    %c0_95 = arith.constant 0 : index
    %172 = vector.load %arg4[%c11, %c0_94, %c0_95] : memref<16x8x64xf32, #tpu.memory_space<vmem>>, vector<1x8x64xf32>
    %173 = vector.shape_cast %172 : vector<1x8x64xf32> to vector<8x64xf32>
    %cst_96 = arith.constant dense<0.000000e+00> : vector<1x64xf32>
    %174 = tpu.matmul %171, %173, %cst_96 {dimension_numbers = #tpu.dot_dimension_numbers<[1], [0], [0], [1], [0, 0, 1, 1], [], []>} : vector<1x8xf32>, vector<8x64xf32>, vector<1x64xf32> -> vector<1x64xf32>
    %175 = arith.addf %170, %174 : vector<1x64xf32>
    %176 = vector.extract_strided_slice %114 {offsets = [12, 0], sizes = [1, 8], strides = [1, 1]} : vector<16x8xf32> to vector<1x8xf32>
    %c12 = arith.constant 12 : index
    %c0_97 = arith.constant 0 : index
    %c0_98 = arith.constant 0 : index
    %177 = vector.load %arg4[%c12, %c0_97, %c0_98] : memref<16x8x64xf32, #tpu.memory_space<vmem>>, vector<1x8x64xf32>
    %178 = vector.shape_cast %177 : vector<1x8x64xf32> to vector<8x64xf32>
    %cst_99 = arith.constant dense<0.000000e+00> : vector<1x64xf32>
    %179 = tpu.matmul %176, %178, %cst_99 {dimension_numbers = #tpu.dot_dimension_numbers<[1], [0], [0], [1], [0, 0, 1, 1], [], []>} : vector<1x8xf32>, vector<8x64xf32>, vector<1x64xf32> -> vector<1x64xf32>
    %180 = arith.addf %175, %179 : vector<1x64xf32>
    %181 = vector.extract_strided_slice %114 {offsets = [13, 0], sizes = [1, 8], strides = [1, 1]} : vector<16x8xf32> to vector<1x8xf32>
    %c13 = arith.constant 13 : index
    %c0_100 = arith.constant 0 : index
    %c0_101 = arith.constant 0 : index
    %182 = vector.load %arg4[%c13, %c0_100, %c0_101] : memref<16x8x64xf32, #tpu.memory_space<vmem>>, vector<1x8x64xf32>
    %183 = vector.shape_cast %182 : vector<1x8x64xf32> to vector<8x64xf32>
    %cst_102 = arith.constant dense<0.000000e+00> : vector<1x64xf32>
    %184 = tpu.matmul %181, %183, %cst_102 {dimension_numbers = #tpu.dot_dimension_numbers<[1], [0], [0], [1], [0, 0, 1, 1], [], []>} : vector<1x8xf32>, vector<8x64xf32>, vector<1x64xf32> -> vector<1x64xf32>
    %185 = arith.addf %180, %184 : vector<1x64xf32>
    %186 = vector.extract_strided_slice %114 {offsets = [14, 0], sizes = [1, 8], strides = [1, 1]} : vector<16x8xf32> to vector<1x8xf32>
    %c14 = arith.constant 14 : index
    %c0_103 = arith.constant 0 : index
    %c0_104 = arith.constant 0 : index
    %187 = vector.load %arg4[%c14, %c0_103, %c0_104] : memref<16x8x64xf32, #tpu.memory_space<vmem>>, vector<1x8x64xf32>
    %188 = vector.shape_cast %187 : vector<1x8x64xf32> to vector<8x64xf32>
    %cst_105 = arith.constant dense<0.000000e+00> : vector<1x64xf32>
    %189 = tpu.matmul %186, %188, %cst_105 {dimension_numbers = #tpu.dot_dimension_numbers<[1], [0], [0], [1], [0, 0, 1, 1], [], []>} : vector<1x8xf32>, vector<8x64xf32>, vector<1x64xf32> -> vector<1x64xf32>
    %190 = arith.addf %185, %189 : vector<1x64xf32>
    %191 = vector.extract_strided_slice %114 {offsets = [15, 0], sizes = [1, 8], strides = [1, 1]} : vector<16x8xf32> to vector<1x8xf32>
    %c15 = arith.constant 15 : index
    %c0_106 = arith.constant 0 : index
    %c0_107 = arith.constant 0 : index
    %192 = vector.load %arg4[%c15, %c0_106, %c0_107] : memref<16x8x64xf32, #tpu.memory_space<vmem>>, vector<1x8x64xf32>
    %193 = vector.shape_cast %192 : vector<1x8x64xf32> to vector<8x64xf32>
    %cst_108 = arith.constant dense<0.000000e+00> : vector<1x64xf32>
    %194 = tpu.matmul %191, %193, %cst_108 {dimension_numbers = #tpu.dot_dimension_numbers<[1], [0], [0], [1], [0, 0, 1, 1], [], []>} : vector<1x8xf32>, vector<8x64xf32>, vector<1x64xf32> -> vector<1x64xf32>
    %195 = arith.addf %190, %194 : vector<1x64xf32>
    %196 = vector.extract_strided_slice %195 {offsets = [0, 0], sizes = [1, 32], strides = [1, 1]} : vector<1x64xf32> to vector<1x32xf32>
    %197 = vector.extract_strided_slice %195 {offsets = [0, 32], sizes = [1, 32], strides = [1, 1]} : vector<1x64xf32> to vector<1x32xf32>
    %198 = arith.addf %196, %197 : vector<1x32xf32>
    %cst_109 = arith.constant 5.000000e-01 : f32
    %199 = vector.broadcast %cst_109 : f32 to vector<1x32xf32>
    %200 = arith.mulf %198, %199 : vector<1x32xf32>
    %cst_110 = arith.constant 0.000000e+00 : f32
    %201 = vector.broadcast %cst_110 : f32 to vector<1x32xf32>
    %202 = arith.subf %196, %200 : vector<1x32xf32>
    %203 = arith.mulf %202, %202 : vector<1x32xf32>
    %204 = arith.addf %201, %203 : vector<1x32xf32>
    %205 = arith.subf %197, %200 : vector<1x32xf32>
    %206 = arith.mulf %205, %205 : vector<1x32xf32>
    %207 = arith.addf %204, %206 : vector<1x32xf32>
    %cst_111 = arith.constant 5.000000e-01 : f32
    %208 = vector.broadcast %cst_111 : f32 to vector<1x32xf32>
    %209 = arith.mulf %207, %208 : vector<1x32xf32>
    %cst_112 = arith.constant 9.99999974E-6 : f32
    %210 = vector.broadcast %cst_112 : f32 to vector<1x32xf32>
    %211 = arith.addf %209, %210 : vector<1x32xf32>
    %212 = math.rsqrt %211 : vector<1x32xf32>
    %c0_113 = arith.constant 0 : index
    %c0_114 = arith.constant 0 : index
    %213 = vector.load %arg3[%c0_113, %c0_114] : memref<1x32xf32, #tpu.memory_space<vmem>>, vector<1x32xf32>
    %c0_115 = arith.constant 0 : index
    %c0_116 = arith.constant 0 : index
    %214 = vector.load %arg1[%c0_115, %c0_116] : memref<1x32xf32, #tpu.memory_space<vmem>>, vector<1x32xf32>
    %c0_117 = arith.constant 0 : index
    %c0_118 = arith.constant 0 : index
    %215 = vector.load %arg20[%c0_117, %c0_118] : memref<2x32xf32, #tpu.memory_space<vmem>>, vector<1x32xf32>
    tpu.vector_store %arg20[%c0_117, %c0_118], %196 {strides = array<i32>} : memref<2x32xf32, #tpu.memory_space<vmem>>, vector<1x32xf32>,
    %216 = arith.subf %196, %200 : vector<1x32xf32>
    %217 = arith.mulf %216, %212 : vector<1x32xf32>
    %218 = arith.mulf %213, %217 : vector<1x32xf32>
    %219 = arith.addf %218, %214 : vector<1x32xf32>
    %c0_119 = arith.constant 0 : index
    %c0_120 = arith.constant 0 : index
    %220 = vector.load %arg19[%c0_119, %c0_120] : memref<2x32xf32, #tpu.memory_space<vmem>>, vector<1x32xf32>
    tpu.vector_store %arg19[%c0_119, %c0_120], %219 {strides = array<i32>} : memref<2x32xf32, #tpu.memory_space<vmem>>, vector<1x32xf32>,
    %c1_121 = arith.constant 1 : index
    %c0_122 = arith.constant 0 : index
    %221 = vector.load %arg20[%c1_121, %c0_122] : memref<2x32xf32, #tpu.memory_space<vmem>>, vector<1x32xf32>
    tpu.vector_store %arg20[%c1_121, %c0_122], %197 {strides = array<i32>} : memref<2x32xf32, #tpu.memory_space<vmem>>, vector<1x32xf32>,
    %222 = arith.subf %197, %200 : vector<1x32xf32>
    %223 = arith.mulf %222, %212 : vector<1x32xf32>
    %224 = arith.mulf %213, %223 : vector<1x32xf32>
    %225 = arith.addf %224, %214 : vector<1x32xf32>
    %c1_123 = arith.constant 1 : index
    %c0_124 = arith.constant 0 : index
    %226 = vector.load %arg19[%c1_123, %c0_124] : memref<2x32xf32, #tpu.memory_space<vmem>>, vector<1x32xf32>
    tpu.vector_store %arg19[%c1_123, %c0_124], %225 {strides = array<i32>} : memref<2x32xf32, #tpu.memory_space<vmem>>, vector<1x32xf32>,
    return
  }
}

</mosaic_0001>

<bundles_post_ra>
// kernel: forward.1
= control target key start
LH: loop header
LB: loop body
LE: loop exit
PB: predicated region body
PF: predicated region fallthrough
CT: control target
= control target key end

     0   :  { %s4009_s0 = inlined_call_operand.vmem [shape: f32[3,32], index: 0, kind: input, shape index: {}]   ;;  %s4010_s1 = inlined_call_operand.vmem [shape: f32[1,32], index: 1, kind: input, shape index: {}]   ;;  %s4011_s2 = inlined_call_operand.hbm [shape: f32[1,64], index: 2, kind: input, shape index: {}]   ;;  %s4012_s3 = inlined_call_operand.vmem [shape: f32[1,32], index: 3, kind: input, shape index: {}]   ;;  %s4013_s4 = inlined_call_operand.hbm [shape: f32[16,8,64], index: 4, kind: input, shape index: {}]   ;;  %s4014_s5 = inlined_call_operand.hbm [shape: f32[8,1], index: 5, kind: input, shape index: {}]   ;;  %s4015_s6 = inlined_call_operand.vmem [shape: f32[32,16], index: 6, kind: input, shape index: {}]   ;;  %s4016_s7 = inlined_call_operand.hbm [shape: f32[8,12], index: 7, kind: input, shape index: {}]   ;;  %s4017_s8 = inlined_call_operand.hbm [shape: f32[16,1], index: 8, kind: input, shape index: {}]   ;;  %s4018_s9 = inlined_call_operand.hbm [shape: f32[16,8], index: 9, kind: input, shape index: {}]   ;;  %s4019_s10 = inlined_call_operand.vmem [shape: f32[16,24], index: 10, kind: input, shape index: {}]   ;;  %s4020_s11 = inlined_call_operand.vmem [shape: f32[1,32], index: 11, kind: input, shape index: {}]   ;;  %s4021_s12 = inlined_call_operand.vmem [shape: f32[1,32], index: 12, kind: input, shape index: {}]   ;;  %s4022_s13 = inlined_call_operand.vmem [shape: f32[1,16], index: 13, kind: input, shape index: {}]   ;;  %s4023_s14 = inlined_call_operand.vmem [shape: f32[1,16], index: 14, kind: input, shape index: {}]   ;;  %s4024_s15 = inlined_call_operand.vmem [shape: f32[2,1], index: 15, kind: input, shape index: {}]   ;;  %s4025_s16 = inlined_call_operand.vmem [shape: f32[2,9], index: 16, kind: input, shape index: {}]   ;;  %s4026_s17 = inlined_call_operand.vmem [shape: f32[2,1], index: 17, kind: input, shape index: {}]   ;;  %s4027_s18 = inlined_call_operand.vmem [shape: f32[2,9], index: 18, kind: input, shape index: {}]   ;;  %s4028_s19 = inlined_call_operand.hbm [shape: f32[2,32], index: 19, kind: output, shape index: {0}]   ;;  %s4029_s20 = inlined_call_operand.hbm [shape: f32[2,32], index: 20, kind: output, shape index: {1}]  }
   0x1   :  { %4034 = sst [smem:[#allocation22_spill]] %s4009_s0 }
   0x2   :  { %4035 = sst [smem:[#allocation23_spill]] %s4010_s1 }
   0x3   :  { %4036 = sst [smem:[#allocation24_spill]] %s4011_s2 }
   0x4   :  { %4037 = sst [smem:[#allocation25_spill]] %s4012_s3 }
   0x5   :  { %4038 = sst [smem:[#allocation26_spill]] %s4013_s4 }
   0x6   :  { %4039 = sst [smem:[#allocation27_spill]] %s4028_s19 }
   0x7   :  { %4040 = sst [smem:[#allocation28_spill]] %s4029_s20 }
   0x8   :  { %26 = vsyncpa [#allocation3], 0 }
   0x9   :  { %27 = vsyncpa [#allocation6], 0 }
   0xa   :  { %28 = vsyncpa [#allocation9], 0 }
   0xb   :  { %29 = vsyncpa [#allocation12], 0 }
   0xc   :  { %30 = vsyncpa [#allocation4], 0 }
   0xd   :  { %31 = vsyncpa [#allocation15], 0  ;;  %s3513_s1 = smov [#allocation5]   ;;  %s4041_s2 = sld [smem:[#allocation26_spill]] }
   0xe   :  { %s53_s22 = sshll.u32 %s3513_s1, 4  ;;  %s54_s22 = int_to_ptr.vmem [resolvable:$true] %s53_s22 }
  0x13   :  { %s3325_s25 = scalar_lea.hbm %s4041_s2, 2048 }
  0x14   :  { %p3326_p0 = scmp.ne.s32.totalorder %s4041_s2, %s3325_s25  ;;  %p3329_p1 = scmp.lt.u32.totalorder %s3325_s25, %s4041_s2 }
  0x16   :  { %p3331_p2 = pnand %p3329_p1, %p3326_p0 }
  0x18   :  { %3334 = shalt.err (!%p3331_p2)
}
  0x19   :  { %s3335_s4 = scalar_lea.vmem %s54_s22, 2048  ;;  %p3340_p4 = scmp.lt.s32.totalorder %s54_s22, %s54_s22 }
  0x1a   :  { %p3336_p3 = scmp.ne.s32.totalorder %s54_s22, %s3335_s4  ;;  %p3341_p5 = scmp.lt.s32.totalorder %s3335_s4, %s3335_s4 }
  0x1c   :  { %p3342_p6 = por %p3341_p5, %p3340_p4 }
  0x1e   :  { %p3343_p7 = pnand %p3342_p6, %p3336_p3 }
  0x20   :  { %3346 = shalt.err (!%p3343_p7)
}
  0x21   :  { %s3514_s29 = smov 128   ;;  %s3515_s30 = smov 8  }
  0x22   :  { %59 = dma.hbm_to_vmem [thread:$0]  %s4041_s2, 2048, %s54_s22, [#allocation6], %s3514_s29, %s3514_s29, %s3515_s30  }
  0x23   :  { %s3516_s1 = smov [#allocation8]   ;;  %s3517_s24 = smov [#allocation2]  }
  0x24   :  { %s78_s23 = sshll.u32 %s3516_s1, 4  ;;  %s42_s25 = sshll.u32 %s3517_s24, 4  ;;  %s79_s23 = int_to_ptr.vmem [resolvable:$true] %s78_s23  ;;  %s43_s25 = int_to_ptr.vmem [resolvable:$true] %s42_s25 }
  0x25   :  { %s3347_s27 = scalar_lea.hbm %s4016_s7, 128 }
  0x26   :  { %p3348_p8 = scmp.ne.s32.totalorder %s4016_s7, %s3347_s27  ;;  %p3351_p9 = scmp.lt.u32.totalorder %s3347_s27, %s4016_s7 }
  0x28   :  { %p3353_p10 = pnand %p3351_p9, %p3348_p8 }
  0x2a   :  { %3356 = shalt.err (!%p3353_p10)
}
  0x2b   :  { %s3357_s22 = scalar_lea.vmem %s79_s23, 128  ;;  %p3362_p12 = scmp.lt.s32.totalorder %s79_s23, %s79_s23 }
  0x2c   :  { %p3358_p11 = scmp.ne.s32.totalorder %s79_s23, %s3357_s22  ;;  %p3363_p13 = scmp.lt.s32.totalorder %s3357_s22, %s3357_s22 }
  0x2e   :  { %p3364_p0 = por %p3363_p13, %p3362_p12 }
  0x30   :  { %p3365_p1 = pnand %p3364_p0, %p3358_p11 }
  0x32   :  { %3368 = shalt.err (!%p3365_p1)
}
  0x33   :  { %81 = dma.hbm_to_vmem [thread:$0]  %s4016_s7, 128, %s79_s23, [#allocation9]  }
  0x34   :  { %s4042_s24 = sld [smem:[#allocation24_spill]] }
  0x3a   :  { %s3369_s3 = scalar_lea.hbm %s4042_s24, 16 }
  0x3b   :  { %p3370_p2 = scmp.ne.s32.totalorder %s4042_s24, %s3369_s3  ;;  %p3373_p3 = scmp.lt.u32.totalorder %s3369_s3, %s4042_s24 }
  0x3d   :  { %p3375_p4 = pnand %p3373_p3, %p3370_p2 }
  0x3f   :  { %3378 = shalt.err (!%p3375_p4)
}
  0x40   :  { %s3379_s28 = scalar_lea.vmem %s43_s25, 16  ;;  %s3383_s4 = scalar_lea.vmem %s43_s25, 32 }
  0x41   :  { %p3380_p5 = scmp.ne.s32.totalorder %s43_s25, %s3379_s28  ;;  %p3384_p6 = scmp.lt.s32.totalorder %s43_s25, %s43_s25 }
  0x42   :  { %p3385_p7 = scmp.lt.s32.totalorder %s3383_s4, %s3379_s28 }
  0x44   :  { %p3386_p8 = por %p3385_p7, %p3384_p6 }
  0x46   :  { %p3387_p9 = pnand %p3386_p8, %p3380_p5 }
  0x48   :  { %3390 = shalt.err (!%p3387_p9)
}
  0x49   :  { %45 = dma.hbm_to_vmem [thread:$0]  %s4042_s24, 16, %s43_s25, [#allocation3]  }
  0x4a   :  { %s3518_s22 = smov [#allocation7]   ;;  %s3519_s0 = smov [#allocation10]  }
  0x4b   :  { %s66_s2 = sshll.u32 %s3518_s22, 4  ;;  %s87_s21 = sshll.u32 %s3519_s0, 4  ;;  %s67_s2 = int_to_ptr.vmem [resolvable:$true] %s66_s2  ;;  %s88_s21 = int_to_ptr.vmem [resolvable:$true] %s87_s21 }
  0x4c   :  { %s3391_s19 = scalar_lea.hbm %s4014_s5, 128 }
  0x4d   :  { %p3392_p10 = scmp.ne.s32.totalorder %s4014_s5, %s3391_s19  ;;  %p3395_p11 = scmp.lt.u32.totalorder %s3391_s19, %s4014_s5 }
  0x4f   :  { %p3397_p12 = pnand %p3395_p11, %p3392_p10 }
  0x51   :  { %3400 = shalt.err (!%p3397_p12)
}
  0x52   :  { %s3401_s25 = scalar_lea.vmem %s67_s2, 128  ;;  %p3406_p0 = scmp.lt.s32.totalorder %s67_s2, %s67_s2 }
  0x53   :  { %p3402_p13 = scmp.ne.s32.totalorder %s67_s2, %s3401_s25  ;;  %p3407_p1 = scmp.lt.s32.totalorder %s3401_s25, %s3401_s25 }
  0x55   :  { %p3408_p2 = por %p3407_p1, %p3406_p0 }
  0x57   :  { %p3409_p3 = pnand %p3408_p2, %p3402_p13 }
  0x59   :  { %3412 = shalt.err (!%p3409_p3)
}
  0x5a   :  { %69 = dma.hbm_to_vmem [thread:$0]  %s4014_s5, 128, %s67_s2, [#allocation6]  }
  0x5b   :  { %s3413_s22 = scalar_lea.hbm %s4017_s8, 256 }
  0x5c   :  { %p3414_p4 = scmp.ne.s32.totalorder %s4017_s8, %s3413_s22  ;;  %p3417_p5 = scmp.lt.u32.totalorder %s3413_s22, %s4017_s8 }
  0x5e   :  { %p3419_p6 = pnand %p3417_p5, %p3414_p4 }
  0x60   :  { %3422 = shalt.err (!%p3419_p6)
}
  0x61   :  { %s3423_s20 = scalar_lea.vmem %s88_s21, 256  ;;  %p3428_p8 = scmp.lt.s32.totalorder %s88_s21, %s88_s21 }
  0x62   :  { %p3424_p7 = scmp.ne.s32.totalorder %s88_s21, %s3423_s20  ;;  %p3429_p9 = scmp.lt.s32.totalorder %s3423_s20, %s3423_s20 }
  0x64   :  { %p3430_p10 = por %p3429_p9, %p3428_p8 }
  0x66   :  { %p3431_p11 = pnand %p3430_p10, %p3424_p7 }
  0x68   :  { %3434 = shalt.err (!%p3431_p11)
}
  0x69   :  { %93 = dma.hbm_to_vmem [thread:$0]  %s4017_s8, 256, %s88_s21, [#allocation9], %s3514_s29, %s3514_s29, %s3515_s30  }
  0x6a   :  { %s3520_s26 = smov [#allocation11]   ;;  %s3435_s24 = scalar_lea.hbm %s4018_s9, 256 }
  0x6b   :  { %s99_s27 = sshll.u32 %s3520_s26, 4  ;;  %p3436_p12 = scmp.ne.s32.totalorder %s4018_s9, %s3435_s24  ;;  %s100_s27 = int_to_ptr.vmem [resolvable:$true] %s99_s27 }
  0x6c   :  { %p3439_p13 = scmp.lt.u32.totalorder %s3435_s24, %s4018_s9 }
  0x6e   :  { %p3441_p0 = pnand %p3439_p13, %p3436_p12 }
  0x70   :  { %3444 = shalt.err (!%p3441_p0)
}
  0x71   :  { %s3445_s0 = scalar_lea.vmem %s100_s27, 256  ;;  %p3450_p2 = scmp.lt.s32.totalorder %s100_s27, %s100_s27 }
  0x72   :  { %p3446_p1 = scmp.ne.s32.totalorder %s100_s27, %s3445_s0  ;;  %p3451_p3 = scmp.lt.s32.totalorder %s3445_s0, %s3445_s0 }
  0x74   :  { %p3452_p4 = por %p3451_p3, %p3450_p2 }
  0x76   :  { %p3453_p5 = pnand %p3452_p4, %p3446_p1 }
  0x78   :  { %3456 = shalt.err (!%p3453_p5)
}
  0x79   :  { %105 = dma.hbm_to_vmem [thread:$0]  %s4018_s9, 256, %s100_s27, [#allocation12], %s3514_s29, %s3514_s29, %s3515_s30  }
  0x7a   :  { %3501 = dma.done.wait [#allocation3], 16  }
  0x7b   :  { %3502 = vsyncadd [#allocation3], 4294967280 }
  0x7c   :  { %3503 = dma.done.wait [#allocation6], 2176  }
  0x7d   :  { %3504 = vsyncadd [#allocation6], 4294965120 }
  0x7e   :  { %3505 = dma.done.wait [#allocation9], 384  }
  0x7f   :  { %3506 = vsyncadd [#allocation9], 4294966912 }
  0x80   :  { %3507 = dma.done.wait [#allocation12], 256  }
  0x81   :  { %3508 = vsyncadd [#allocation12], 4294967040  ;;  %s4043_s19 = sld [smem:[#allocation22_spill]]  ;;  %s3521_s20 = smov 32   ;;  %vm149_vm0 = vcmask 1047808   ;;  %v157_v3 = vlaneseq  ;;  %v3526_v18 = vmov 0.0  }
  0x82   :  { %v142_v5 = vld [vmem:[%s4020_s11] sm:$0x1]  ;;  %s3522_s2 = smov 98   ;;  %s3523_s26 = smov 1   ;;  %3071 = vmatprep.subr.mxu1 %v3526_v18  ;;  %3121 = vmatprep.subr.mxu0 %v3526_v18  ;;  %vm171_vm1 = vcmask 1042432   ;;  %vm3528_vm2 = vmmov 0  }
  0x83   :  { %v158_v4 = vshrl.u32 %v157_v3, 7  ;;  %v143_v6 = vld [vmem:[%s4021_s12] sm:$0x1]  ;;  %s3524_s11 = smov 127   ;;  %s3525_s12 = smov 31   ;;  %3073 = vmatprep.mubr.msk.f32.mxu1 %vm3528_vm2, %v3526_v18  ;;  %3123 = vmatprep.mubr.msk.f32.mxu0 %vm3528_vm2, %v3526_v18  ;;  %vm168_vm3 = vcmask 23552  }
  0x84   :  { %v417_v8 = vmul.f32 %v143_v6, %v142_v5  ;;  %v147_v21 = vld [vmem:[%s4027_s18] sm:$0x3]  ;;  %s3527_s25 = smov 125   ;;  %s3529_s18 = smov 97   ;;  %v3531_v30 = vmov 0   ;;  %vm712_vm4 = vcmask 1041408  }
  0x85   :  { %v3743_v7 = vsub.s32 0, %v158_v4  ;;  %v433_v28 = vld [vmem:[%s4025_s16] sm:$0x3]  ;;  %s3530_s7 = smov 122   ;;  %3322 = vset.pattern.permute.xlu0 %v3531_v30  ;;  %3321 = vset.pattern.permute.xlu1 %v3531_v30  ;;  %v687_v4 = vld [vmem:[#allocation8] sm:$0xff]  ;;  %s3534_s8 = smov 120  }
  0x86   :  { %v434_v37 = vld [vmem:[%s4024_s15] sm:$0x3]  ;;  %s3532_s15 = smov 126   ;;  %s3535_s21 = smov 118   ;;  %vm709_vm5 = vcmask 15360   ;;  %v1189_v30 = vld [vmem:[%s4015_s6 + $0x18] sm:$0xff] }
  0x87   :  { %v146_v0 = vld [vmem:[%s4043_s19] sm:$0x7]  ;;  %v428_v11 = vrot.slane %v417_v8, %v3743_v7  ;;  %v160_v17 = vrot.slane %v142_v5, %v3743_v7  ;;  %v326_v20 = vrot.slane %v143_v6, %v3743_v7  ;;  %vm1190_vm6 = vcmask 261120   ;;  %s3539_s24 = smov 2   ;;  %s4044_s22 = sld [smem:[#allocation25_spill]] }
  0x88   :  { %150 = vrot.lane.b32.xlu0 %v146_v0, %s3521_s20  ;;  %3072 = vmatpush3.msk.msra.mxu1 %vm171_vm1, %v146_v0  ;;  %v148_v39 = vld [vmem:[%s4026_s17] sm:$0x3]  ;;  %s3533_s17 = smov 124   ;;  %vm1268_vm7 = vcmask 1047680   ;;  %vm1290_vm8 = vcmask 64512   ;;  %vm1565_vm9 = vcmask 130048  }
  0x89   :  { %3076 = vmatprep.subr.mxu1 %v3526_v18  ;;  %vm2888_vm10 = vcmask 253952  }
  0xfa   :  { %v151_v1 = vpop.permute.xlu0 %150 }
  0xfb   :  { %v152_v2 = vsel %vm149_vm0, %v151_v1, %v146_v0 }
  0xfc   :  { %153 = vrot.lane.b32.xlu0 %v152_v2, %s3521_s20 }
 0x16e   :  { %v154_v9 = vpop.permute.xlu0 %153 }
 0x16f   :  { %v155_v10 = vsel %vm149_vm0, %v154_v9, %v146_v0 }
 0x170   :  { %419 = vrot.lane.b32.xlu1 %v155_v10, %s3522_s2 }
 0x174   :  { %429 = vrot.lane.b32.xlu1 %v428_v11, %s3523_s26 }
 0x1e2   :  { %v420_v12 = vpop.permute.xlu1 %419 }
 0x1e3   :  { %v422_v13 = vsub.f32 %v155_v10, %v420_v12 }
 0x1e5   :  { %v423_v14 = vmul.f32 0.5, %v422_v13 }
 0x1e6   :  { %v430_v15 = vpop.permute.xlu1 %429 }
 0x1e7   :  { %v432_v16 = vmul.f32 %v430_v15, %v423_v14  ;;  %v688_v14 = vld [vmem:[#allocation7] sm:$0xff] }
 0x1e9   :  { %436 = vrot.lane.b32.xlu0 %v432_v16, %s3524_s11 }
 0x1ed   :  { %161 = vrot.lane.b32.xlu0 %v160_v17, %s3525_s12  ;;  %s3538_s12 = smov 14  }
 0x25b   :  { %v437_v19 = vpop.permute.xlu0 %436 }
 0x25c   :  { %439 = vrot.lane.b32.xlu1 %v437_v19, %s3521_s20 }
 0x25f   :  { %v3762_v23 = vpop.permute.xlu0 %161 }
 0x260   :  { %327 = vrot.lane.b32.xlu1 %v326_v20, %s3523_s26  ;;  %v164_v26 = vmul.f32 %v3762_v23, %v155_v10 }
 0x264   :  { %166 = vrot.lane.b32.xlu1 %v147_v21, %s3527_s25 }
 0x2ce   :  { %v440_v22 = vpop.permute.xlu1 %439 }
 0x2cf   :  { %v441_v24 = vsel %vm149_vm0, %v440_v22, %v437_v19 }
 0x2d0   :  { %442 = vrot.lane.b32.xlu0 %v441_v24, %s3521_s20 }
 0x2d2   :  { %v3766_v25 = vpop.permute.xlu1 %327 }
 0x2d3   :  { %v330_v27 = vmul.f32 %v3766_v25, %v155_v10 }
 0x2d4   :  { %246 = vrot.lane.b32.xlu0 %v164_v26, %s3529_s18  ;;  %v1187_v26 = vld [vmem:[%s4015_s6 + $0x8] sm:$0xff] }
 0x2d5   :  { %334 = vrot.lane.b32.xlu1 %v330_v27, %s3524_s11 }
 0x2d6   :  { %v167_v29 = vpop.permute.xlu1 %166 }
 0x2d7   :  { %3074 = vmatmul.mubr.msk.f32.vlgmr.msra.gmra.mrb[0].mxu1 %vm168_vm3, %v167_v29  ;;  %v1188_v29 = vld [vmem:[%s4015_s6 + $0x10] sm:$0xff] }
 0x2d8   :  { %331 = vrot.lane.b32.xlu0 %v147_v21, %s3530_s7  ;;  %3078 = vmatprep.mubr.msk.f32.mxu1 %vm3528_vm2, %v3526_v18 }
 0x2d9   :  { %447 = vrot.lane.b32.xlu1 %v433_v28, %s3527_s25 }
 0x342   :  { %v443_v31 = vpop.permute.xlu0 %442 }
 0x343   :  { %v444_v32 = vsel %vm149_vm0, %v443_v31, %v437_v19  ;;  %v3248_v31 = vpack.c.bf16 %v1189_v30, %v1188_v29  ;;  %v1952_v29 = vld [vmem:[#allocation5 + $0x20] sm:$0xff] }
 0x344   :  { %v445_v33 = vmul.f32 %v444_v32, %v3762_v23  ;;  %v600_v34 = vmul.f32 %v444_v32, %v3766_v25 }
 0x346   :  { %604 = vrot.lane.b32.xlu1 %v600_v34, %s3524_s11  ;;  %524 = vrot.lane.b32.xlu0 %v445_v33, %s3529_s18  ;;  %v247_v35 = vpop.permute.xlu0 %246 }
 0x347   :  { %v335_v36 = vpop.permute.xlu1 %334  ;;  %3077 = vmatpush3.msk.msra.mxu1 %vm171_vm1, %v247_v35 }
 0x348   :  { %3079 = vmatmul.mubr.msk.f32.vlgmr.msra.gmra.mrb[2].mxu1 %vm168_vm3, %v147_v21  ;;  %3081 = vmatprep.subr.mxu1 %v3526_v18 }
 0x349   :  { %3082 = vmatpush3.msk.msra.mxu1 %vm171_vm1, %v335_v36  ;;  %3083 = vmatprep.mubr.msk.f32.mxu1 %vm3528_vm2, %v3526_v18 }
 0x34a   :  { %601 = vrot.lane.b32.xlu0 %v433_v28, %s3530_s7  ;;  %3086 = vmatprep.subr.mxu1 %v3526_v18  ;;  %v332_v38 = vpop.permute.xlu0 %331 }
 0x34b   :  { %683 = vperm.xlu1 %3321, %v434_v37   ;;  %v448_v40 = vpop.permute.xlu1 %447 }
 0x34c   :  { %3084 = vmatmul.mubr.msk.f32.vlgmr.msra.gmra.mrb[4].mxu1 %vm168_vm3, %v332_v38 }
 0x34d   :  { %3087 = vmatpush3.msk.msra.mxu1 %vm171_vm1, %v437_v19  ;;  %3088 = vmatprep.mubr.msk.f32.mxu1 %vm3528_vm2, %v3526_v18 }
 0x34e   :  { %3091 = vmatprep.subr.mxu1 %v3526_v18  ;;  %413 = vperm.xlu0 %3322, %v148_v39  }
 0x350   :  { %3089 = vmatmul.mubr.msk.f32.vlgmr.msra.gmra.mrb[6].mxu1 %vm168_vm3, %v448_v40 }
 0x351   :  { %3093 = vmatprep.mubr.msk.f32.mxu1 %vm3528_vm2, %v3526_v18 }
 0x3aa   :  { %v241_v41 = vpop.f32.mrb[0].mxu1 }
 0x3ab   :  { %v3075_v42 = vpop.f32.mrb[1].mxu1 }
 0x3b8   :  { %v525_v43 = vpop.permute.xlu0 %524  ;;  %v605_v44 = vpop.permute.xlu1 %604 }
 0x3b9   :  { %3092 = vmatpush3.msk.msra.mxu1 %vm171_vm1, %v525_v43 }
 0x3ba   :  { %3094 = vmatmul.mubr.msk.f32.vlgmr.msra.gmra.mrb[8].mxu1 %vm168_vm3, %v433_v28  ;;  %3096 = vmatprep.subr.mxu1 %v3526_v18  ;;  %v3536_v28 = vmov 0.0|0.0  }
 0x3bb   :  { %3097 = vmatpush3.msk.msra.mxu1 %vm171_vm1, %v605_v44  ;;  %3098 = vmatprep.mubr.msk.f32.mxu1 %vm3528_vm2, %v3526_v18 }
 0x3bc   :  { %v602_v45 = vpop.permute.xlu0 %601  ;;  %3101 = vmatprep.subr.mxu1 %v3526_v18 }
 0x3be   :  { %3099 = vmatmul.mubr.msk.f32.vlgmr.msra.gmra.mrb[10].mxu1 %vm168_vm3, %v602_v45 }
 0x3bf   :  { %3103 = vmatprep.mubr.msk.f32.mxu1 %vm3528_vm2, %v3526_v18 }
 0x3ca   :  { %v684_v58 = vpop.permute.xlu1 %683 }
 0x3cd   :  { %v414_v62 = vpop.permute.xlu0 %413 }
 0x41b   :  { %v318_v46 = vpop.f32.mrb[2].mxu1 }
 0x41c   :  { %v319_v47 = vadd.f32 %v318_v46, %v241_v41  ;;  %v3080_v48 = vpop.f32.mrb[3].mxu1 }
 0x41f   :  { %v406_v49 = vpop.f32.mrb[4].mxu1 }
 0x420   :  { %v410_v50 = vadd.f32 %v406_v49, %v319_v47  ;;  %v3085_v51 = vpop.f32.mrb[5].mxu1 }
 0x422   :  { %v416_v63 = vadd.f32 %v414_v62, %v410_v50 }
 0x423   :  { %v519_v52 = vpop.f32.mrb[6].mxu1 }
 0x424   :  { %v3090_v53 = vpop.f32.mrb[7].mxu1 }
 0x425   :  { %v2971_v53 = vld [vmem:[%s4022_s13] ss:$0 sm:$0xff] }
 0x48d   :  { %v596_v54 = vpop.f32.mrb[8].mxu1 }
 0x48e   :  { %v597_v55 = vadd.f32 %v596_v54, %v519_v52  ;;  %v3095_v56 = vpop.f32.mrb[9].mxu1  ;;  %v1264_v54 = vld [vmem:[%s4019_s10] sm:$0xff] }
 0x491   :  { %v676_v57 = vpop.f32.mrb[10].mxu1 }
 0x492   :  { %v680_v59 = vadd.f32 %v676_v57, %v597_v55  ;;  %v3100_v60 = vpop.f32.mrb[11].mxu1  ;;  %v2976_v57 = vld [vmem:[%s4023_s14] ss:$0 sm:$0xff]  ;;  %s3541_s14 = smov 112  }
 0x494   :  { %v686_v61 = vadd.f32 %v684_v58, %v680_v59  ;;  %v1265_v59 = vld [vmem:[%s4019_s10 + $0x8] sm:$0xff]  ;;  %s3542_s10 = smov 96  }
 0x496   :  { %696 = vrot.lane.b32.xlu1 %v686_v61, %s3521_s20 }
 0x49a   :  { %689 = vrot.lane.b32.xlu1 %v416_v63, %s3521_s20 }
 0x508   :  { %v697_v0 = vpop.permute.xlu1 %696 }
 0x509   :  { %v698_v1 = vsel %vm149_vm0, %v697_v0, %v686_v61 }
 0x50a   :  { %699 = vrot.lane.b32.xlu0 %v698_v1, %s3521_s20 }
 0x50c   :  { %v690_v2 = vpop.permute.xlu1 %689 }
 0x50d   :  { %v691_v3 = vsel %vm149_vm0, %v690_v2, %v416_v63 }
 0x50e   :  { %692 = vrot.lane.b32.xlu1 %v691_v3, %s3521_s20  ;;  %v1266_v3 = vld [vmem:[#allocation10] sm:$0xff] }
 0x512   :  { %704 = vrot.lane.b32.xlu1 %v687_v4, %s3532_s15 }
 0x516   :  { %862 = vrot.lane.b32.xlu1 %v687_v4, %s3533_s17  ;;  %s4045_s17 = sld [smem:[#allocation23_spill]] }
 0x57c   :  { %v700_v5 = vpop.permute.xlu0 %699 }
 0x57d   :  { %v701_v6 = vsel %vm149_vm0, %v700_v5, %v686_v61 }
 0x57e   :  { %v702_v8 = vmul.f32 %v701_v6, %v3762_v23  ;;  %v1099_v13 = vmul.f32 %v701_v6, %v3766_v25 }
 0x580   :  { %v693_v9 = vpop.permute.xlu1 %692  ;;  %707 = vrot.lane.b32.xlu0 %v702_v8, %s3529_s18 }
 0x581   :  { %v694_v10 = vsel %vm149_vm0, %v693_v9, %v416_v63 }
 0x582   :  { %v695_v11 = vmul.f32 %v694_v10, %v3762_v23  ;;  %v1018_v12 = vmul.f32 %v694_v10, %v3766_v25  ;;  %v1186_v25 = vld [vmem:[%s4015_s6] sm:$0xff]  ;;  %s3537_s6 = smov 16  }
 0x583   :  { %v3245_v27 = vpack.c.bf16 %v1187_v26, %v1186_v25  ;;  %v1563_v10 = vld [vmem:[#allocation11] sm:$0xff]  ;;  %v1800_v25 = vld [vmem:[#allocation5 + $0x10] sm:$0xff] }
 0x584   :  { %1022 = vrot.lane.b32.xlu1 %v1018_v12, %s3524_s11  ;;  %786 = vrot.lane.b32.xlu0 %v695_v11, %s3529_s18  ;;  %v705_v15 = vpop.permute.xlu1 %704  ;;  %v1564_v11 = vld [vmem:[#allocation11 + $0x8] sm:$0xff] }
 0x585   :  { %v3250_v12 = vpack.c.bf16 %v1564_v11, %v1563_v10 }
 0x588   :  { %1103 = vrot.lane.b32.xlu1 %v1099_v13, %s3524_s11  ;;  %940 = vrot.lane.b32.xlu0 %v687_v4, %s3530_s7  ;;  %v863_v16 = vpop.permute.xlu1 %862  ;;  %s3540_s7 = smov 114  }
 0x58c   :  { %1182 = vperm.xlu1 %3321, %v688_v14   ;;  %1019 = vrot.lane.b32.xlu0 %v687_v4, %s3534_s8 }
 0x590   :  { %1100 = vrot.lane.b32.xlu0 %v687_v4, %s3535_s21 }
 0x5f2   :  { %v708_v17 = vpop.permute.xlu0 %707 }
 0x5f3   :  { %3102 = vmatpush3.msk.msra.mxu1 %vm712_vm4, %v708_v17 }
 0x5f4   :  { %3104 = vmatmul.mubr.msk.f32.vlgmr.msra.gmra.mrb[12].mxu1 %vm709_vm5, %v705_v15  ;;  %3106 = vmatprep.subr.mxu1 %v3526_v18 }
 0x5f5   :  { %3108 = vmatprep.mubr.msk.f32.mxu1 %vm3528_vm2, %v3526_v18 }
 0x5f6   :  { %v1023_v19 = vpop.permute.xlu1 %1022  ;;  %v787_v20 = vpop.permute.xlu0 %786 }
 0x5f7   :  { %3107 = vmatpush3.msk.msra.mxu1 %vm712_vm4, %v787_v20  ;;  %3122 = vmatpush3.msk.msra.mxu0 %vm712_vm4, %v1023_v19  ;;  %v1648_v20 = vld [vmem:[#allocation5] sm:$0xff] }
 0x5f8   :  { %3109 = vmatmul.mubr.msk.f32.vlgmr.msra.gmra.mrb[14].mxu1 %vm709_vm5, %v687_v4  ;;  %3111 = vmatprep.subr.mxu1 %v3526_v18  ;;  %v1267_v4 = vld [vmem:[#allocation10 + $0x8] sm:$0xff] }
 0x5f9   :  { %3112 = vmatpush3.msk.msra.mxu1 %vm712_vm4, %v416_v63  ;;  %3113 = vmatprep.mubr.msk.f32.mxu1 %vm3528_vm2, %v3526_v18 }
 0x5fa   :  { %v941_v21 = vpop.permute.xlu0 %940  ;;  %3116 = vmatprep.subr.mxu1 %v3526_v18  ;;  %3164 = vmatprep.subr.mxu0 %v3526_v18  ;;  %v1104_v23 = vpop.permute.xlu1 %1103 }
 0x5fc   :  { %3114 = vmatmul.mubr.msk.f32.vlgmr.msra.gmra.mrb[16].mxu1 %vm709_vm5, %v863_v16 }
 0x5fd   :  { %3117 = vmatpush3.msk.msra.mxu1 %vm712_vm4, %v686_v61  ;;  %3118 = vmatprep.mubr.msk.f32.mxu1 %vm3528_vm2, %v3526_v18 }
 0x5fe   :  { %v1020_v22 = vpop.permute.xlu0 %1019  ;;  %3126 = vmatprep.subr.mxu1 %v3526_v18 }
 0x5ff   :  { %3124 = vmatmul.mubr.msk.f32.vlgmr.msra.gmra.mrb[0].mxu0 %vm709_vm5, %v1020_v22  ;;  %v1724_v22 = vld [vmem:[#allocation5 + $0x8] sm:$0xff] }
 0x600   :  { %3119 = vmatmul.mubr.msk.f32.vlgmr.msra.gmra.mrb[18].mxu1 %vm709_vm5, %v941_v21  ;;  %3166 = vmatprep.mubr.msk.f32.mxu0 %vm3528_vm2, %v3526_v18 }
 0x601   :  { %3127 = vmatpush3.msk.msra.mxu1 %vm712_vm4, %v1104_v23  ;;  %3128 = vmatprep.mubr.msk.f32.mxu1 %vm3528_vm2, %v3526_v18 }
 0x602   :  { %v1101_v24 = vpop.permute.xlu0 %1100  ;;  %3244 = vmatprep.subr.bf16.mxu1 %v3536_v28  ;;  %3165 = vmatpush3.msra.mxu0 %v1648_v20 }
 0x603   :  { %3169 = vmatprep.subr.mxu0 %v3526_v18 }
 0x604   :  { %3129 = vmatmul.mubr.msk.f32.vlgmr.msra.gmra.mrb[20].mxu1 %vm709_vm5, %v1101_v24 }
 0x605   :  { %3139 = vmatprep.mubr.msk.f32.mxu1 %vm3528_vm2, %v3526_v18  ;;  %3246 = vmatpush3.bf16.msra.mxu1 %v3245_v27  ;;  %v1876_v27 = vld [vmem:[#allocation5 + $0x18] sm:$0xff] }
 0x606   :  { %3247 = vmatprep.subr.bf16.mxu1 %v3536_v28 }
 0x609   :  { %3249 = vmatpush3.bf16.msra.mxu1 %v3248_v31  ;;  %v2028_v31 = vld [vmem:[#allocation5 + $0x28] sm:$0xff] }
 0x60b   :  { %v1183_v49 = vpop.permute.xlu1 %1182 }
 0x6c7   :  { %v781_v32 = vpop.f32.mrb[12].mxu1 }
 0x6c8   :  { %v3105_v33 = vpop.f32.mrb[13].mxu1 }
 0x6c9   :  { %v2104_v33 = vld [vmem:[#allocation5 + $0x30] sm:$0xff] }
 0x6cb   :  { %v858_v34 = vpop.f32.mrb[14].mxu1 }
 0x6cc   :  { %v859_v35 = vadd.f32 %v858_v34, %v781_v32  ;;  %v3110_v36 = vpop.f32.mrb[15].mxu1 }
 0x6cf   :  { %v935_v37 = vpop.f32.mrb[16].mxu1 }
 0x6d0   :  { %v939_v38 = vadd.f32 %v935_v37, %v859_v35  ;;  %v3115_v39 = vpop.f32.mrb[17].mxu1  ;;  %v2180_v35 = vld [vmem:[#allocation5 + $0x38] sm:$0xff]  ;;  %v2256_v37 = vld [vmem:[#allocation5 + $0x40] sm:$0xff] }
 0x6d2   :  { %v1094_v40 = vpop.f32.mrb[0].mxu0 }
 0x6d3   :  { %v1013_v41 = vpop.f32.mrb[18].mxu1  ;;  %v3125_v42 = vpop.f32.mrb[1].mxu0 }
 0x6d4   :  { %v1017_v43 = vadd.f32 %v1013_v41, %v939_v38  ;;  %v3120_v44 = vpop.f32.mrb[19].mxu1  ;;  %v2332_v38 = vld [vmem:[#allocation5 + $0x48] sm:$0xff]  ;;  %v2484_v42 = vld [vmem:[#allocation5 + $0x58] sm:$0xff] }
 0x6d5   :  { %v2560_v44 = vld [vmem:[#allocation5 + $0x60] sm:$0xff] }
 0x6d6   :  { %v1098_v45 = vadd.f32 %v1094_v40, %v1017_v43  ;;  %v2408_v40 = vld [vmem:[#allocation5 + $0x50] sm:$0xff] }
 0x6d7   :  { %v1175_v46 = vpop.f32.mrb[20].mxu1 }
 0x6d8   :  { %v1179_v47 = vadd.f32 %v1175_v46, %v1098_v45  ;;  %v3130_v48 = vpop.f32.mrb[21].mxu1  ;;  %v2636_v46 = vld [vmem:[#allocation5 + $0x68] sm:$0xff] }
 0x6d9   :  { %v2712_v48 = vld [vmem:[#allocation5 + $0x70] sm:$0xff] }
 0x6da   :  { %v1185_v50 = vadd.f32 %v1183_v49, %v1179_v47 }
 0x6dc   :  { %3140 = vmatmul.mubr.msk.f32.vlgmr.msra.gmra.mrb[22].mxu1 %vm1190_vm6, %v1185_v50  ;;  %v2788_v50 = vld [vmem:[#allocation5 + $0x78] sm:$0xff] }
 0x7af   :  { %v1260_v51 = vpop.f32.mrb[22].mxu1 }
 0x7b0   :  { %1269 = vrot.lane.b32.xlu0 %v1260_v51, %s3537_s6  ;;  %v3141_v52 = vpop.f32.mrb[23].mxu1  ;;  %3142 = vmatprep.subr.mxu1 %v1260_v51 }
 0x7b1   :  { %3143 = vmatpush3.msra.mxu1 %v1260_v51  ;;  %v1647_v52 = vld [vmem:[#allocation2] sm:$0x1] }
 0x7b4   :  { %1280 = vrot.lane.b32.xlu0 %v2971_v53, %s3538_s12 }
 0x7b8   :  { %1286 = vrot.lane.b32.xlu0 %v1264_v54, %s3534_s8 }
 0x822   :  { %v1270_v55 = vpop.permute.xlu0 %1269 }
 0x823   :  { %v1271_v56 = vsel %vm1268_vm7, %v1270_v55, %v1260_v51 }
 0x824   :  { %1272 = vrot.lane.b32.xlu1 %v1271_v56, %s3537_s6 }
 0x826   :  { %v1281_v58 = vpop.permute.xlu0 %1280 }
 0x828   :  { %1458 = vrot.lane.b32.xlu1 %v2976_v57, %s3539_s24 }
 0x82a   :  { %v1287_v60 = vpop.permute.xlu0 %1286 }
 0x82b   :  { %3144 = vmatprep.mubr.msk.f32.mxu1 %vm1290_vm8, %v1287_v60 }
 0x82c   :  { %1288 = vrot.lane.b32.xlu1 %v1265_v59, %s3534_s8  ;;  %s3543_s8 = smov [#allocation14]  }
 0x82d   :  { %s2930_s21 = sshll.u32 %s3543_s8, 4  ;;  %s2931_s21 = int_to_ptr.vmem [resolvable:$true] %s2930_s21 }
 0x82e   :  { %p3462_p7 = scmp.lt.s32.totalorder %s2931_s21, %s2931_s21 }
 0x896   :  { %v1273_v61 = vpop.permute.xlu1 %1272 }
 0x897   :  { %v1274_v62 = vsel %vm1268_vm7, %v1273_v61, %v1260_v51 }
 0x898   :  { %v1283_v63 = vmul.f32 %v1281_v58, %v1274_v62 }
 0x89a   :  { %v1459_v0 = vpop.permute.xlu1 %1458  ;;  %1371 = vrot.lane.b32.xlu0 %v1283_v63, %s3540_s7 }
 0x89b   :  { %v1461_v1 = vmul.f32 %v1459_v0, %v1274_v62 }
 0x89d   :  { %1467 = vrot.lane.b32.xlu1 %v1461_v1, %s3532_s15 }
 0x89e   :  { %1462 = vrot.lane.b32.xlu0 %v1264_v54, %s3541_s14  ;;  %v1289_v2 = vpop.permute.xlu1 %1288 }
 0x89f   :  { %3145 = vmatmul.mubr.msk.f32.vlgmr.msra.gmra.mrb[24].mxu1 %vm1290_vm8, %v1289_v2 }
 0x8a0   :  { %3149 = vmatprep.mubr.msk.f32.mxu1 %vm1290_vm8, %v1264_v54 }
 0x8a1   :  { %1464 = vrot.lane.b32.xlu1 %v1265_v59, %s3541_s14 }
 0x8a2   :  { %1553 = vperm.xlu0 %3322, %v1266_v3  }
 0x8a5   :  { %1558 = vperm.xlu1 %3321, %v1267_v4   ;;  %v2886_v4 = vld [vmem:[%s4044_s22] sm:$0x1] }
 0x90c   :  { %v1372_v5 = vpop.permute.xlu0 %1371 }
 0x90d   :  { %3147 = vmatprep.subr.mxu1 %v1372_v5 }
 0x90e   :  { %3148 = vmatpush3.msra.mxu1 %v1372_v5 }
 0x90f   :  { %v1468_v6 = vpop.permute.xlu1 %1467  ;;  %3150 = vmatmul.mubr.msk.f32.vlgmr.msra.gmra.mrb[24].mxu1 %vm1290_vm8, %v1265_v59 }
 0x910   :  { %3152 = vmatprep.subr.mxu1 %v1468_v6  ;;  %v1463_v8 = vpop.permute.xlu0 %1462 }
 0x911   :  { %3153 = vmatpush3.msra.mxu1 %v1468_v6  ;;  %3154 = vmatprep.mubr.msk.f32.mxu1 %vm1290_vm8, %v1463_v8  ;;  %v2887_v6 = vld [vmem:[%s4045_s17] sm:$0x1] }
 0x912   :  { %3251 = vmatprep.subr.bf16.mxu1 %v3250_v12 }
 0x913   :  { %v1465_v9 = vpop.permute.xlu1 %1464 }
 0x917   :  { %3155 = vmatmul.mubr.msk.f32.vlgmr.msra.gmra.mrb[24].mxu1 %vm1290_vm8, %v1465_v9 }
 0x918   :  { %3253 = vmatpush3.bf16.msra.mxu1 %v3250_v12 }
 0x921   :  { %v1554_v14 = vpop.permute.xlu0 %1553 }
 0x924   :  { %v1559_v16 = vpop.permute.xlu1 %1558 }
 0x9ea   :  { %v3156_v13 = vpop.f32.mrb[24].mxu1 }
 0x9eb   :  { %v1540_v15 = vpop.f32.mrb[25].mxu1  ;;  %v1562_v19 = vadd.f32 %v3156_v13, %v1559_v16 }
 0x9ec   :  { %v1561_v17 = vadd.f32 %v1554_v14, %v1540_v15 }
 0x9ee   :  { %3161 = vmatprep.mubr.msk.f32.mxu1 %vm1565_vm9, %v1561_v17 }
 0x9ef   :  { %3162 = vmatmul.mubr.msk.f32.vlgmr.msra.gmra.mrb[26].mxu1 %vm1565_vm9, %v1562_v19 }
 0xac2   :  { %v3898_v21 = vpop.f32.mrb[26].mxu1 }
 0xac3   :  { %v1638_v23 = vpop.f32.mrb[27].mxu1  ;;  %v2333_v39 = vrot.slane %v3898_v21, 1  ;;  %v2409_v41 = vrot.slane %v3898_v21, 2  ;;  %v2485_v43 = vrot.slane %v3898_v21, 3  ;;  %v2561_v45 = vrot.slane %v3898_v21, 4 }
 0xac4   :  { %3167 = vmatmul.mubr.msk.f32.vlgmr.msra.gmra.mrb[2].mxu0 %vm1290_vm8, %v1638_v23  ;;  %v1725_v24 = vrot.slane %v1638_v23, 1  ;;  %v1801_v26 = vrot.slane %v1638_v23, 2  ;;  %v1877_v28 = vrot.slane %v1638_v23, 3  ;;  %v1953_v30 = vrot.slane %v1638_v23, 4 }
 0xac5   :  { %3170 = vmatpush3.msra.mxu0 %v1724_v22  ;;  %3171 = vmatprep.mubr.msk.f32.mxu0 %vm3528_vm2, %v3526_v18  ;;  %v2029_v32 = vrot.slane %v1638_v23, 5  ;;  %v2105_v34 = vrot.slane %v1638_v23, 6  ;;  %v2181_v36 = vrot.slane %v1638_v23, 7  ;;  %v2637_v47 = vrot.slane %v3898_v21, 5 }
 0xac6   :  { %3174 = vmatprep.subr.mxu0 %v3526_v18  ;;  %v2713_v49 = vrot.slane %v3898_v21, 6  ;;  %v2789_v51 = vrot.slane %v3898_v21, 7 }
 0xacc   :  { %3172 = vmatmul.mubr.msk.f32.vlgmr.msra.gmra.mrb[2].mxu0 %vm1290_vm8, %v1725_v24 }
 0xacd   :  { %3175 = vmatpush3.msra.mxu0 %v1800_v25  ;;  %3176 = vmatprep.mubr.msk.f32.mxu0 %vm3528_vm2, %v3526_v18 }
 0xace   :  { %3179 = vmatprep.subr.mxu0 %v3526_v18 }
 0xad4   :  { %3177 = vmatmul.mubr.msk.f32.vlgmr.msra.gmra.mrb[2].mxu0 %vm1290_vm8, %v1801_v26 }
 0xad5   :  { %3180 = vmatpush3.msra.mxu0 %v1876_v27  ;;  %3181 = vmatprep.mubr.msk.f32.mxu0 %vm3528_vm2, %v3526_v18 }
 0xad6   :  { %3184 = vmatprep.subr.mxu0 %v3526_v18 }
 0xadc   :  { %3182 = vmatmul.mubr.msk.f32.vlgmr.msra.gmra.mrb[2].mxu0 %vm1290_vm8, %v1877_v28 }
 0xadd   :  { %3185 = vmatpush3.msra.mxu0 %v1952_v29  ;;  %3186 = vmatprep.mubr.msk.f32.mxu0 %vm3528_vm2, %v3526_v18 }
 0xade   :  { %3189 = vmatprep.subr.mxu0 %v3526_v18 }
 0xae4   :  { %3187 = vmatmul.mubr.msk.f32.vlgmr.msra.gmra.mrb[2].mxu0 %vm1290_vm8, %v1953_v30 }
 0xae5   :  { %3190 = vmatpush3.msra.mxu0 %v2028_v31  ;;  %3191 = vmatprep.mubr.msk.f32.mxu0 %vm3528_vm2, %v3526_v18 }
 0xae6   :  { %3194 = vmatprep.subr.mxu0 %v3526_v18 }
 0xaec   :  { %3192 = vmatmul.mubr.msk.f32.vlgmr.msra.gmra.mrb[2].mxu0 %vm1290_vm8, %v2029_v32 }
 0xaed   :  { %3195 = vmatpush3.msra.mxu0 %v2104_v33  ;;  %3196 = vmatprep.mubr.msk.f32.mxu0 %vm3528_vm2, %v3526_v18 }
 0xaee   :  { %3199 = vmatprep.subr.mxu0 %v3526_v18 }
 0xaf4   :  { %3197 = vmatmul.mubr.msk.f32.vlgmr.msra.gmra.mrb[2].mxu0 %vm1290_vm8, %v2105_v34 }
 0xaf5   :  { %3200 = vmatpush3.msra.mxu0 %v2180_v35  ;;  %3201 = vmatprep.mubr.msk.f32.mxu0 %vm3528_vm2, %v3526_v18 }
 0xaf6   :  { %3204 = vmatprep.subr.mxu0 %v3526_v18 }
 0xafc   :  { %3202 = vmatmul.mubr.msk.f32.vlgmr.msra.gmra.mrb[2].mxu0 %vm1290_vm8, %v2181_v36 }
 0xafd   :  { %3205 = vmatpush3.msra.mxu0 %v2256_v37  ;;  %3206 = vmatprep.mubr.msk.f32.mxu0 %vm3528_vm2, %v3526_v18 }
 0xafe   :  { %3209 = vmatprep.subr.mxu0 %v3526_v18 }
 0xb04   :  { %3207 = vmatmul.mubr.msk.f32.vlgmr.msra.gmra.mrb[2].mxu0 %vm1290_vm8, %v3898_v21 }
 0xb05   :  { %3210 = vmatpush3.msra.mxu0 %v2332_v38  ;;  %3211 = vmatprep.mubr.msk.f32.mxu0 %vm3528_vm2, %v3526_v18 }
 0xb06   :  { %3214 = vmatprep.subr.mxu0 %v3526_v18 }
 0xb0c   :  { %3212 = vmatmul.mubr.msk.f32.vlgmr.msra.gmra.mrb[2].mxu0 %vm1290_vm8, %v2333_v39 }
 0xb0d   :  { %3215 = vmatpush3.msra.mxu0 %v2408_v40  ;;  %3216 = vmatprep.mubr.msk.f32.mxu0 %vm3528_vm2, %v3526_v18 }
 0xb0e   :  { %3219 = vmatprep.subr.mxu0 %v3526_v18 }
 0xb14   :  { %3217 = vmatmul.mubr.msk.f32.vlgmr.msra.gmra.mrb[2].mxu0 %vm1290_vm8, %v2409_v41 }
 0xb15   :  { %3220 = vmatpush3.msra.mxu0 %v2484_v42  ;;  %3221 = vmatprep.mubr.msk.f32.mxu0 %vm3528_vm2, %v3526_v18 }
 0xb16   :  { %3224 = vmatprep.subr.mxu0 %v3526_v18 }
 0xb1c   :  { %3222 = vmatmul.mubr.msk.f32.vlgmr.msra.gmra.mrb[2].mxu0 %vm1290_vm8, %v2485_v43 }
 0xb1d   :  { %3225 = vmatpush3.msra.mxu0 %v2560_v44  ;;  %3226 = vmatprep.mubr.msk.f32.mxu0 %vm3528_vm2, %v3526_v18 }
 0xb1e   :  { %3229 = vmatprep.subr.mxu0 %v3526_v18 }
 0xb24   :  { %3227 = vmatmul.mubr.msk.f32.vlgmr.msra.gmra.mrb[2].mxu0 %vm1290_vm8, %v2561_v45 }
 0xb25   :  { %3230 = vmatpush3.msra.mxu0 %v2636_v46  ;;  %3231 = vmatprep.mubr.msk.f32.mxu0 %vm3528_vm2, %v3526_v18 }
 0xb26   :  { %3234 = vmatprep.subr.mxu0 %v3526_v18 }
 0xb2c   :  { %3232 = vmatmul.mubr.msk.f32.vlgmr.msra.gmra.mrb[2].mxu0 %vm1290_vm8, %v2637_v47 }
 0xb2d   :  { %3235 = vmatpush3.msra.mxu0 %v2712_v48  ;;  %3236 = vmatprep.mubr.msk.f32.mxu0 %vm3528_vm2, %v3526_v18 }
 0xb2e   :  { %3239 = vmatprep.subr.mxu0 %v3526_v18 }
 0xb34   :  { %3237 = vmatmul.mubr.msk.f32.vlgmr.msra.gmra.mrb[2].mxu0 %vm1290_vm8, %v2713_v49 }
 0xb35   :  { %3240 = vmatpush3.msra.mxu0 %v2788_v50  ;;  %3241 = vmatprep.mubr.msk.f32.mxu0 %vm3528_vm2, %v3526_v18 }
 0xb3c   :  { %3242 = vmatmul.mubr.msk.f32.vlgmr.msra.gmra.mrb[2].mxu0 %vm1290_vm8, %v2789_v51 }
 0xc0f   :  { %v2858_v53 = vpop.f32.mrb[2].mxu0 }
 0xc10   :  { %v3254_v54 = vadd.f32 %v2858_v53, %v1647_v52  ;;  %v3243_v55 = vpop.f32.mrb[3].mxu0 }
 0xc12   :  { %2864 = vrot.lane.b32.xlu0 %v3254_v54, %s3542_s10  ;;  %2889 = vst.msk [vmem:[#allocation14] sm:$0x1] %vm2888_vm10, %v3254_v54  ;;  %v2897_v8 = vrot.slane %v3254_v54, %v3743_v7 }
 0xc84   :  { %v2865_v56 = vpop.permute.xlu0 %2864 }
 0xc85   :  { %v2867_v57 = vadd.f32 %v3254_v54, %v2865_v56 }
 0xc87   :  { %v2868_v58 = vmul.f32 0.5, %v2867_v57 }
 0xc89   :  { %2873 = vrot.lane.b32.xlu1 %v2868_v58, %s3521_s20  ;;  %v2869_v61 = vsub.f32 %v3254_v54, %v2868_v58 }
 0xc8b   :  { %v2870_v62 = vmul.f32 %v2869_v61, %v2869_v61 }
 0xcfb   :  { %v2874_v18 = vpop.permute.xlu1 %2873 }
 0xcfc   :  { %v2876_v59 = vsub.f32 %v3254_v54, %v2874_v18 }
 0xcfe   :  { %v2877_v60 = vmul.f32 %v2876_v59, %v2876_v59 }
 0xd00   :  { %2879 = vrot.lane.b32.xlu0 %v2877_v60, %s3542_s10 }
 0xd72   :  { %v2880_v63 = vpop.permute.xlu0 %2879 }
 0xd73   :  { %v2882_v0 = vadd.f32 %v2880_v63, %v2870_v62 }
 0xd75   :  { %v2883_v1 = vmul.f32 0.5, %v2882_v0 }
 0xd77   :  { %v2884_v2 = vadd.f32 1e-05, %v2883_v1 }
 0xd79   :  { %3323 = vrsqrt.f32 %v2884_v2 }
 0xd83   :  { %v3324_v3 = vpop.eup %3323 }
 0xd84   :  { %2903 = vrot.lane.b32.xlu1 %v3324_v3, %s3521_s20  ;;  %v2890_v5 = vmul.f32 %v3324_v3, %v2869_v61  ;;  %s3457_s20 = scalar_lea.vmem %s2931_s21, 32 }
 0xd85   :  { %p3458_p6 = scmp.ne.s32.totalorder %s2931_s21, %s3457_s20  ;;  %p3463_p8 = scmp.lt.s32.totalorder %s3457_s20, %s3457_s20 }
 0xd86   :  { %v2891_v9 = vmul.f32 %v2890_v5, %v2886_v4 }
 0xd87   :  { %p3464_p9 = por %p3463_p8, %p3462_p7 }
 0xd88   :  { %2898 = vrot.lane.b32.xlu1 %v2897_v8, %s3542_s10  ;;  %v2892_v10 = vadd.f32 %v2891_v9, %v2887_v6 }
 0xd89   :  { %p3465_p10 = pnand %p3464_p9, %p3458_p6 }
 0xd8a   :  { %2893 = vst.msk [vmem:[#allocation13] sm:$0x1] %vm2888_vm10, %v2892_v10 }
 0xdf6   :  { %v2904_v11 = vpop.permute.xlu1 %2903 }
 0xdf7   :  { %v2906_v12 = vmul.f32 %v2904_v11, %v2876_v59 }
 0xdf9   :  { %2908 = vrot.lane.b32.xlu0 %v2906_v12, %s3542_s10 }
 0xdfa   :  { %v2899_v13 = vpop.permute.xlu1 %2898 }
 0xdfb   :  { %2901 = vst.msk [vmem:[#allocation14 + $0x1] sm:$0x1] %vm2888_vm10, %v2899_v13 }
 0xdfc   :  { %3468 = shalt.err (!%p3465_p10)
}
 0xdfd   :  { %s4046_s19 = sld [smem:[#allocation28_spill]] }
 0xe03   :  { %s3469_s9 = scalar_lea.hbm %s4046_s19, 32 }
 0xe04   :  { %p3470_p11 = scmp.ne.s32.totalorder %s4046_s19, %s3469_s9  ;;  %p3473_p12 = scmp.lt.u32.totalorder %s3469_s9, %s4046_s19 }
 0xe06   :  { %p3475_p13 = pnand %p3473_p12, %p3470_p11 }
 0xe08   :  { %3478 = shalt.err (!%p3475_p13)
}
 0xe09   :  { %2933 = dma.vmem_to_hbm [thread:$0]  %s2931_s21, 32, %s4046_s19, [#allocation15]  }
 0xe0a   :  { %s3544_s11 = smov [#allocation13]  }
 0xe0b   :  { %s2920_s12 = sshll.u32 %s3544_s11, 4  ;;  %s2921_s12 = int_to_ptr.vmem [resolvable:$true] %s2920_s12 }
 0xe0c   :  { %s3479_s27 = scalar_lea.vmem %s2921_s12, 32  ;;  %p3484_p1 = scmp.lt.s32.totalorder %s2921_s12, %s2921_s12 }
 0xe0d   :  { %p3480_p0 = scmp.ne.s32.totalorder %s2921_s12, %s3479_s27  ;;  %p3485_p2 = scmp.lt.s32.totalorder %s3479_s27, %s3479_s27 }
 0xe0f   :  { %p3486_p3 = por %p3485_p2, %p3484_p1 }
 0xe11   :  { %p3487_p4 = pnand %p3486_p3, %p3480_p0 }
 0xe6b   :  { %v2909_v7 = vpop.permute.xlu0 %2908 }
 0xe6c   :  { %v2911_v14 = vmul.f32 %v2909_v7, %v2886_v4 }
 0xe6e   :  { %v2912_v15 = vadd.f32 %v2911_v14, %v2887_v6 }
 0xe70   :  { %2913 = vst.msk [vmem:[#allocation13 + $0x1] sm:$0x1] %vm2888_vm10, %v2912_v15 }
 0xe71   :  { %3490 = shalt.err (!%p3487_p4)
}
 0xe72   :  { %s4047_s18 = sld [smem:[#allocation27_spill]] }
 0xe78   :  { %s3491_s24 = scalar_lea.hbm %s4047_s18, 32 }
 0xe79   :  { %p3492_p5 = scmp.ne.s32.totalorder %s4047_s18, %s3491_s24  ;;  %p3495_p6 = scmp.lt.u32.totalorder %s3491_s24, %s4047_s18 }
 0xe7b   :  { %p3497_p7 = pnand %p3495_p6, %p3492_p5 }
 0xe7d   :  { %3500 = shalt.err (!%p3497_p7)
}
 0xe7e   :  { %2923 = dma.vmem_to_hbm [thread:$0]  %s2921_s12, 32, %s4047_s18, [#allocation4]  }
 0xe7f   :  { %3509 = dma.done.wait [#allocation4], 32  }
 0xe80   :  { %3510 = vsyncadd [#allocation4], 4294967264 }
 0xe81   :  { %3511 = dma.done.wait [#allocation15], 32  }
 0xe82   :  { %3512 = vsyncadd [#allocation15], 4294967264 }
 0xe83   :  { %2940 = vsyncpa [#allocation3], 1 }
 0xe84   :  { %2941 = vsyncpa [#allocation6], 1 }
 0xe85   :  { %2942 = vsyncpa [#allocation9], 1 }
 0xe86   :  { %2943 = vsyncpa [#allocation12], 1 }
 0xe87   :  { %2944 = vsyncpa [#allocation4], 1 }
 0xe88   :  { %2945 = vsyncpa [#allocation15], 1 }

</bundles_post_ra>
